<compile_context>
chip_gen: v7x
topology: tpu7x:2x2x1
jax: 0.10.0
libtpu: 0.0.40
codegen_flags: <defaults>
</compile_context>

<pallas_src>
import functools

import jax
import jax.numpy as jnp
import numpy as np
from jax.experimental import pallas as pl
from jax.experimental.pallas import tpu as pltpu


def sab_kernel(x_ref, wq_ref, bq_ref, wk_ref, bk_ref, wv_ref, bv_ref,
               wo_ref, bo_ref, g1_ref, b1_ref, wf_ref, bf_ref,
               g2_ref, b2_ref, o_ref, *, num_heads, head_dim, batch_block):
    eps = 1e-5
    inv_temp = 1.0 / (head_dim ** 0.5)
    n = x_ref.shape[1]
    d = x_ref.shape[2]

    def layer_norm(z, g, bb):
        mu = jnp.mean(z, axis=-1, keepdims=True)
        var = jnp.mean((z - mu) ** 2, axis=-1, keepdims=True)
        return (z - mu) * jax.lax.rsqrt(var + eps) * g + bb

    for bi in range(batch_block):            # static unroll over sets in block
        x = x_ref[bi]                         # [n, d]
        xf = x.astype(jnp.float32)            # exact residual path
        xb = x.astype(jnp.bfloat16)           # bf16 MXU operand

        # Multi-head attention with the head concat fused into the output
        # projection: mh = sum_h softmax(q_h k_h^T / sqrt(p)) v_h @ Wo_h
        mh = jnp.zeros((n, d), jnp.float32)
        for hd in range(num_heads):
            qh = jnp.dot(xb, wq_ref[hd],
                         preferred_element_type=jnp.float32) + bq_ref[hd]
            kh = jnp.dot(xb, wk_ref[hd],
                         preferred_element_type=jnp.float32) + bk_ref[hd]
            vh = jnp.dot(xb, wv_ref[hd],
                         preferred_element_type=jnp.float32) + bv_ref[hd]
            qh = qh * inv_temp                # fold scale into [n, p] tile

            # scores: q_h @ k_h^T via dot_general (no materialized transpose)
            s = jax.lax.dot_general(
                qh.astype(jnp.bfloat16), kh.astype(jnp.bfloat16),
                (((1,), (1,)), ((), ())),
                preferred_element_type=jnp.float32)           # [n, n] f32
            s = s - jnp.max(s, axis=-1, keepdims=True)
            e = jnp.exp(s)
            a = e * pl.reciprocal(jnp.sum(e, axis=-1, keepdims=True),
                                  approx=True)                # EUP reciprocal
            oh = jnp.dot(a.astype(jnp.bfloat16), vh.astype(jnp.bfloat16),
                         preferred_element_type=jnp.float32)  # [n, p]
            mh = mh + jnp.dot(oh.astype(jnp.bfloat16), wo_ref[hd],
                              preferred_element_type=jnp.float32)  # [n, d]
        mh = mh + bo_ref[...]

        # residual + LayerNorm1
        h1 = layer_norm(xf + mh, g1_ref[...], b1_ref[...])

        # row-wise feedforward: Linear(d, d) + ReLU
        ff = jnp.dot(h1.astype(jnp.bfloat16), wf_ref[...],
                     preferred_element_type=jnp.float32) + bf_ref[...]
        ff = jnp.maximum(ff, 0.0)

        # residual + LayerNorm2
        out = layer_norm(h1 + ff, g2_ref[...], b2_ref[...])
        o_ref[bi] = out.astype(o_ref.dtype)


def set_attention_block(x, params, *, num_heads, batch_block=1):
    b, n, d = x.shape
    assert d % num_heads == 0 and b % batch_block == 0
    p = d // num_heads
    (wq, bq, wk, bk, wv, bv, wo, bo, g1, b1, wf, bf, g2, b2) = params

    # Host-side weight prep: head-major layouts so in-kernel slicing is along
    # the leading axis only; matmul weights in bf16, biases / LN params in f32.
    def head_in(w):          # [d, d] -> [h, d, p] (bf16)
        return w.reshape(d, num_heads, p).transpose(1, 0, 2).astype(jnp.bfloat16)

    def head_bias(bb):       # [1, d] -> [h, 1, p] (f32)
        return bb.reshape(num_heads, 1, p).astype(jnp.float32)

    wq_h, wk_h, wv_h = head_in(wq), head_in(wk), head_in(wv)
    bq_h, bk_h, bv_h = head_bias(bq), head_bias(bk), head_bias(bv)
    wo_h = wo.reshape(num_heads, p, d).astype(jnp.bfloat16)
    wf_b = wf.astype(jnp.bfloat16)
    bo_f = bo.astype(jnp.float32)
    bf_f = bf.astype(jnp.float32)
    g1_f, b1_f = g1.astype(jnp.float32), b1.astype(jnp.float32)
    g2_f, b2_f = g2.astype(jnp.float32), b2.astype(jnp.float32)

    # Grid-invariant specs (constant index_map -> fetched once).
    w_head_spec = pl.BlockSpec((num_heads, d, p), lambda i: (0, 0, 0))
    b_head_spec = pl.BlockSpec((num_heads, 1, p), lambda i: (0, 0, 0))
    wo_spec = pl.BlockSpec((num_heads, p, d), lambda i: (0, 0, 0))
    w_full_spec = pl.BlockSpec((d, d), lambda i: (0, 0))
    row_spec = pl.BlockSpec((1, d), lambda i: (0, 0))

    kernel = functools.partial(sab_kernel, num_heads=num_heads, head_dim=p,
                               batch_block=batch_block)
    return pl.pallas_call(
        kernel,
        out_shape=jax.ShapeDtypeStruct((b, n, d), x.dtype),
        grid_spec=pltpu.PrefetchScalarGridSpec(
            num_scalar_prefetch=0,
            grid=(b // batch_block,),
            in_specs=[
                pl.BlockSpec((batch_block, n, d), lambda i: (i, 0, 0)),  # x
                w_head_spec, b_head_spec,                                # Wq, bq
                w_head_spec, b_head_spec,                                # Wk, bk
                w_head_spec, b_head_spec,                                # Wv, bv
                wo_spec, row_spec,                                       # Wo, bo
                row_spec, row_spec,                                      # ln1 g, b
                w_full_spec, row_spec,                                   # W_rff, b_rff
                row_spec, row_spec,                                      # ln2 g, b
            ],
            out_specs=pl.BlockSpec((batch_block, n, d), lambda i: (i, 0, 0)),
        ),
        compiler_params=pltpu.CompilerParams(
            dimension_semantics=("parallel",),
            vmem_limit_bytes=32 * 1024 * 1024),
    )(x, wq_h, bq_h, wk_h, bk_h, wv_h, bv_h, wo_h, bo_f,
      g1_f, b1_f, wf_b, bf_f, g2_f, b2_f)


def reference(x, params, *, num_heads):
    """Pure-JAX f32 reference matching the PyTorch forward."""
    (wq, bq, wk, bk, wv, bv, wo, bo, g1, b1, wf, bf, g2, b2) = params
    b, n, d = x.shape
    p = d // num_heads
    q = x @ wq + bq
    k = x @ wk + bk
    v = x @ wv + bv
    q = q.reshape(b, n, num_heads, p).transpose(2, 0, 1, 3)
    k = k.reshape(b, n, num_heads, p).transpose(2, 0, 1, 3)
    v = v.reshape(b, n, num_heads, p).transpose(2, 0, 1, 3)
    s = jnp.einsum('hbnp,hbmp->hbnm', q, k) / (p ** 0.5)
    a = jax.nn.softmax(s, axis=-1)
    o = jnp.einsum('hbnm,hbmp->hbnp', a, v)
    o = o.transpose(1, 2, 0, 3).reshape(b, n, d)
    mh = o @ wo + bo

    def ln(z, g, bb):
        mu = jnp.mean(z, axis=-1, keepdims=True)
        var = jnp.mean((z - mu) ** 2, axis=-1, keepdims=True)
        return (z - mu) * jax.lax.rsqrt(var + 1e-5) * g + bb

    h1 = ln(x + mh, g1, b1)
    ff = jnp.maximum(h1 @ wf + bf, 0.0)
    return ln(h1 + ff, g2, b2)


def init_params(key, d):
    ks = jax.random.split(key, 10)
    scale = 0.1
    wq = jax.random.normal(ks[0], (d, d), jnp.float32) * scale
    bq = jax.random.normal(ks[1], (1, d), jnp.float32) * scale
    wk = jax.random.normal(ks[2], (d, d), jnp.float32) * scale
    bk = jax.random.normal(ks[3], (1, d), jnp.float32) * scale
    wv = jax.random.normal(ks[4], (d, d), jnp.float32) * scale
    bv = jax.random.normal(ks[5], (1, d), jnp.float32) * scale
    wo = jax.random.normal(ks[6], (d, d), jnp.float32) * scale
    bo = jax.random.normal(ks[7], (1, d), jnp.float32) * scale
    g1 = jnp.ones((1, d), jnp.float32)
    b1 = jnp.zeros((1, d), jnp.float32)
    wf = jax.random.normal(ks[8], (d, d), jnp.float32) * scale
    bf = jax.random.normal(ks[9], (1, d), jnp.float32) * scale
    g2 = jnp.ones((1, d), jnp.float32)
    b2 = jnp.zeros((1, d), jnp.float32)
    return (wq, bq, wk, bk, wv, bv, wo, bo, g1, b1, wf, bf, g2, b2)


if __name__ == "__main__":
    b, n, d, h = 2, 8, 32, 4
    key = jax.random.PRNGKey(0)
    kx, kp = jax.random.split(key)
    x = jax.random.normal(kx, (b, n, d), jnp.float32)
    params = init_params(kp, d)

    # batch_block=2: both sets in one grid step (amortizes per-step overhead
    # at these tiny n*d; use batch_block=1 for large sets / megacore sharding).
    out = set_attention_block(x, params, num_heads=h, batch_block=2)
    out = jax.block_until_ready(out)

    ref = reference(x, params, num_heads=h)
    # bf16 MXU operands with f32 accumulation -> widened comparison tolerance.
    np.testing.assert_allclose(np.asarray(out), np.asarray(ref),
                               rtol=3e-2, atol=3e-2)
    print("KERNEL_OK")
</pallas_src>

<mosaic_0001>
module attributes {stable_mosaic.version = 11 : i64} {
  func.func @sab_kernel(%arg0: i32, %arg1: memref<2x8x32xf32, #tpu.memory_space<vmem>>, %arg2: memref<4x32x8xbf16, #tpu.memory_space<vmem>>, %arg3: memref<4x1x8xf32, #tpu.memory_space<vmem>>, %arg4: memref<4x32x8xbf16, #tpu.memory_space<vmem>>, %arg5: memref<4x1x8xf32, #tpu.memory_space<vmem>>, %arg6: memref<4x32x8xbf16, #tpu.memory_space<vmem>>, %arg7: memref<4x1x8xf32, #tpu.memory_space<vmem>>, %arg8: memref<4x8x32xbf16, #tpu.memory_space<vmem>>, %arg9: memref<1x32xf32, #tpu.memory_space<vmem>>, %arg10: memref<1x32xf32, #tpu.memory_space<vmem>>, %arg11: memref<1x32xf32, #tpu.memory_space<vmem>>, %arg12: memref<32x32xbf16, #tpu.memory_space<vmem>>, %arg13: memref<1x32xf32, #tpu.memory_space<vmem>>, %arg14: memref<1x32xf32, #tpu.memory_space<vmem>>, %arg15: memref<1x32xf32, #tpu.memory_space<vmem>>, %arg16: memref<2x8x32xf32, #tpu.memory_space<vmem>>) attributes {dimension_semantics = [#tpu.dimension_semantics<parallel>], iteration_bounds = array<i64: 1>, scalar_prefetch = 0 : i64, scratch_operands = 0 : i64, tpu.core_type = #tpu.core_type<tc>, window_params = [{transform_indices = @transform_0, window_bounds = array<i64: 2, 8, 32>}, {pipeline_mode = #tpu.pipeline_mode<synchronous>, transform_indices = @transform_1, window_bounds = array<i64: 4, 32, 8>}, {pipeline_mode = #tpu.pipeline_mode<synchronous>, transform_indices = @transform_2, window_bounds = array<i64: 4, 1, 8>}, {pipeline_mode = #tpu.pipeline_mode<synchronous>, transform_indices = @transform_3, window_bounds = array<i64: 4, 32, 8>}, {pipeline_mode = #tpu.pipeline_mode<synchronous>, transform_indices = @transform_4, window_bounds = array<i64: 4, 1, 8>}, {pipeline_mode = #tpu.pipeline_mode<synchronous>, transform_indices = @transform_5, window_bounds = array<i64: 4, 32, 8>}, {pipeline_mode = #tpu.pipeline_mode<synchronous>, transform_indices = @transform_6, window_bounds = array<i64: 4, 1, 8>}, {pipeline_mode = #tpu.pipeline_mode<synchronous>, transform_indices = @transform_7, window_bounds = array<i64: 4, 8, 32>}, {pipeline_mode = #tpu.pipeline_mode<synchronous>, transform_indices = @transform_8, window_bounds = array<i64: 1, 32>}, {pipeline_mode = #tpu.pipeline_mode<synchronous>, transform_indices = @transform_9, window_bounds = array<i64: 1, 32>}, {pipeline_mode = #tpu.pipeline_mode<synchronous>, transform_indices = @transform_10, window_bounds = array<i64: 1, 32>}, {pipeline_mode = #tpu.pipeline_mode<synchronous>, transform_indices = @transform_11, window_bounds = array<i64: 32, 32>}, {pipeline_mode = #tpu.pipeline_mode<synchronous>, transform_indices = @transform_12, window_bounds = array<i64: 1, 32>}, {pipeline_mode = #tpu.pipeline_mode<synchronous>, transform_indices = @transform_13, window_bounds = array<i64: 1, 32>}, {pipeline_mode = #tpu.pipeline_mode<synchronous>, transform_indices = @transform_14, window_bounds = array<i64: 1, 32>}, {transform_indices = @transform_15, window_bounds = array<i64: 2, 8, 32>}]} {
    %c0 = arith.constant 0 : index
    %c0_0 = arith.constant 0 : index
    %c0_1 = arith.constant 0 : index
    %0 = vector.load %arg1[%c0, %c0_0, %c0_1] : memref<2x8x32xf32, #tpu.memory_space<vmem>>, vector<1x8x32xf32>
    %1 = vector.shape_cast %0 : vector<1x8x32xf32> to vector<8x32xf32>
    %2 = arith.truncf %1 : vector<8x32xf32> to vector<8x32xbf16>
    %cst = arith.constant 0.000000e+00 : f32
    %3 = vector.broadcast %cst : f32 to vector<8x32xf32>
    %c0_2 = arith.constant 0 : index
    %c0_3 = arith.constant 0 : index
    %c0_4 = arith.constant 0 : index
    %4 = vector.load %arg2[%c0_2, %c0_3, %c0_4] : memref<4x32x8xbf16, #tpu.memory_space<vmem>>, vector<1x32x8xbf16>
    %5 = vector.shape_cast %4 : vector<1x32x8xbf16> to vector<32x8xbf16>
    %cst_5 = arith.constant dense<0.000000e+00> : vector<8x8xf32>
    %6 = tpu.matmul %2, %5, %cst_5 {dimension_numbers = #tpu.dot_dimension_numbers<[1], [0], [0], [1], [0, 0, 1, 1], [], []>} : vector<8x32xbf16>, vector<32x8xbf16>, vector<8x8xf32> -> vector<8x8xf32>
    %c0_6 = arith.constant 0 : index
    %c0_7 = arith.constant 0 : index
    %c0_8 = arith.constant 0 : index
    %7 = vector.load %arg3[%c0_6, %c0_7, %c0_8] : memref<4x1x8xf32, #tpu.memory_space<vmem>>, vector<1x1x8xf32>
    %8 = vector.shape_cast %7 : vector<1x1x8xf32> to vector<1x8xf32>
    %9 = vector.broadcast %8 : vector<1x8xf32> to vector<8x8xf32>
    %10 = arith.addf %6, %9 : vector<8x8xf32>
    %c0_9 = arith.constant 0 : index
    %c0_10 = arith.constant 0 : index
    %c0_11 = arith.constant 0 : index
    %11 = vector.load %arg4[%c0_9, %c0_10, %c0_11] : memref<4x32x8xbf16, #tpu.memory_space<vmem>>, vector<1x32x8xbf16>
    %12 = vector.shape_cast %11 : vector<1x32x8xbf16> to vector<32x8xbf16>
    %cst_12 = arith.constant dense<0.000000e+00> : vector<8x8xf32>
    %13 = tpu.matmul %2, %12, %cst_12 {dimension_numbers = #tpu.dot_dimension_numbers<[1], [0], [0], [1], [0, 0, 1, 1], [], []>} : vector<8x32xbf16>, vector<32x8xbf16>, vector<8x8xf32> -> vector<8x8xf32>
    %c0_13 = arith.constant 0 : index
    %c0_14 = arith.constant 0 : index
    %c0_15 = arith.constant 0 : index
    %14 = vector.load %arg5[%c0_13, %c0_14, %c0_15] : memref<4x1x8xf32, #tpu.memory_space<vmem>>, vector<1x1x8xf32>
    %15 = vector.shape_cast %14 : vector<1x1x8xf32> to vector<1x8xf32>
    %16 = vector.broadcast %15 : vector<1x8xf32> to vector<8x8xf32>
    %17 = arith.addf %13, %16 : vector<8x8xf32>
    %c0_16 = arith.constant 0 : index
    %c0_17 = arith.constant 0 : index
    %c0_18 = arith.constant 0 : index
    %18 = vector.load %arg6[%c0_16, %c0_17, %c0_18] : memref<4x32x8xbf16, #tpu.memory_space<vmem>>, vector<1x32x8xbf16>
    %19 = vector.shape_cast %18 : vector<1x32x8xbf16> to vector<32x8xbf16>
    %cst_19 = arith.constant dense<0.000000e+00> : vector<8x8xf32>
    %20 = tpu.matmul %2, %19, %cst_19 {dimension_numbers = #tpu.dot_dimension_numbers<[1], [0], [0], [1], [0, 0, 1, 1], [], []>} : vector<8x32xbf16>, vector<32x8xbf16>, vector<8x8xf32> -> vector<8x8xf32>
    %c0_20 = arith.constant 0 : index
    %c0_21 = arith.constant 0 : index
    %c0_22 = arith.constant 0 : index
    %21 = vector.load %arg7[%c0_20, %c0_21, %c0_22] : memref<4x1x8xf32, #tpu.memory_space<vmem>>, vector<1x1x8xf32>
    %22 = vector.shape_cast %21 : vector<1x1x8xf32> to vector<1x8xf32>
    %23 = vector.broadcast %22 : vector<1x8xf32> to vector<8x8xf32>
    %24 = arith.addf %20, %23 : vector<8x8xf32>
    %cst_23 = arith.constant 0.353553385 : f32
    %25 = vector.broadcast %cst_23 : f32 to vector<8x8xf32>
    %26 = arith.mulf %10, %25 : vector<8x8xf32>
    %27 = arith.truncf %26 : vector<8x8xf32> to vector<8x8xbf16>
    %28 = arith.truncf %17 : vector<8x8xf32> to vector<8x8xbf16>
    %cst_24 = arith.constant dense<0.000000e+00> : vector<8x8xf32>
    %29 = tpu.matmul %27, %28, %cst_24 {dimension_numbers = #tpu.dot_dimension_numbers<[1], [1], [0], [0], [0, 0, 1, 0], [], []>} : vector<8x8xbf16>, vector<8x8xbf16>, vector<8x8xf32> -> vector<8x8xf32>
    %cst_25 = arith.constant dense<0xFF800000> : vector<8xf32>
    %30 = vector.multi_reduction <maximumf>, %29, %cst_25 [1] : vector<8x8xf32> to vector<8xf32>
    %31 = vector.shape_cast %30 : vector<8xf32> to vector<8x1xf32>
    %32 = vector.broadcast %31 : vector<8x1xf32> to vector<8x8xf32>
    %33 = arith.subf %29, %32 : vector<8x8xf32>
    %34 = math.exp %33 : vector<8x8xf32>
    %cst_26 = arith.constant dense<0.000000e+00> : vector<8xf32>
    %35 = vector.multi_reduction <add>, %34, %cst_26 [1] : vector<8x8xf32> to vector<8xf32>
    %36 = vector.shape_cast %35 : vector<8xf32> to vector<8x1xf32>
    %37 = tpu.reciprocal %36 {approx = true} : vector<8x1xf32> -> vector<8x1xf32>
    %38 = vector.broadcast %37 : vector<8x1xf32> to vector<8x8xf32>
    %39 = arith.mulf %34, %38 : vector<8x8xf32>
    %40 = arith.truncf %39 : vector<8x8xf32> to vector<8x8xbf16>
    %41 = arith.truncf %24 : vector<8x8xf32> to vector<8x8xbf16>
    %cst_27 = arith.constant dense<0.000000e+00> : vector<8x8xf32>
    %42 = tpu.matmul %40, %41, %cst_27 {dimension_numbers = #tpu.dot_dimension_numbers<[1], [0], [0], [1], [0, 0, 1, 1], [], []>} : vector<8x8xbf16>, vector<8x8xbf16>, vector<8x8xf32> -> vector<8x8xf32>
    %43 = arith.truncf %42 : vector<8x8xf32> to vector<8x8xbf16>
    %c0_28 = arith.constant 0 : index
    %c0_29 = arith.constant 0 : index
    %c0_30 = arith.constant 0 : index
    %44 = vector.load %arg8[%c0_28, %c0_29, %c0_30] : memref<4x8x32xbf16, #tpu.memory_space<vmem>>, vector<1x8x32xbf16>
    %45 = vector.shape_cast %44 : vector<1x8x32xbf16> to vector<8x32xbf16>
    %cst_31 = arith.constant dense<0.000000e+00> : vector<8x32xf32>
    %46 = tpu.matmul %43, %45, %cst_31 {dimension_numbers = #tpu.dot_dimension_numbers<[1], [0], [0], [1], [0, 0, 1, 1], [], []>} : vector<8x8xbf16>, vector<8x32xbf16>, vector<8x32xf32> -> vector<8x32xf32>
    %47 = arith.addf %3, %46 : vector<8x32xf32>
    %c1 = arith.constant 1 : index
    %c0_32 = arith.constant 0 : index
    %c0_33 = arith.constant 0 : index
    %48 = vector.load %arg2[%c1, %c0_32, %c0_33] : memref<4x32x8xbf16, #tpu.memory_space<vmem>>, vector<1x32x8xbf16>
    %49 = vector.shape_cast %48 : vector<1x32x8xbf16> to vector<32x8xbf16>
    %cst_34 = arith.constant dense<0.000000e+00> : vector<8x8xf32>
    %50 = tpu.matmul %2, %49, %cst_34 {dimension_numbers = #tpu.dot_dimension_numbers<[1], [0], [0], [1], [0, 0, 1, 1], [], []>} : vector<8x32xbf16>, vector<32x8xbf16>, vector<8x8xf32> -> vector<8x8xf32>
    %c1_35 = arith.constant 1 : index
    %c0_36 = arith.constant 0 : index
    %c0_37 = arith.constant 0 : index
    %51 = vector.load %arg3[%c1_35, %c0_36, %c0_37] : memref<4x1x8xf32, #tpu.memory_space<vmem>>, vector<1x1x8xf32>
    %52 = vector.shape_cast %51 : vector<1x1x8xf32> to vector<1x8xf32>
    %53 = vector.broadcast %52 : vector<1x8xf32> to vector<8x8xf32>
    %54 = arith.addf %50, %53 : vector<8x8xf32>
    %c1_38 = arith.constant 1 : index
    %c0_39 = arith.constant 0 : index
    %c0_40 = arith.constant 0 : index
    %55 = vector.load %arg4[%c1_38, %c0_39, %c0_40] : memref<4x32x8xbf16, #tpu.memory_space<vmem>>, vector<1x32x8xbf16>
    %56 = vector.shape_cast %55 : vector<1x32x8xbf16> to vector<32x8xbf16>
    %cst_41 = arith.constant dense<0.000000e+00> : vector<8x8xf32>
    %57 = tpu.matmul %2, %56, %cst_41 {dimension_numbers = #tpu.dot_dimension_numbers<[1], [0], [0], [1], [0, 0, 1, 1], [], []>} : vector<8x32xbf16>, vector<32x8xbf16>, vector<8x8xf32> -> vector<8x8xf32>
    %c1_42 = arith.constant 1 : index
    %c0_43 = arith.constant 0 : index
    %c0_44 = arith.constant 0 : index
    %58 = vector.load %arg5[%c1_42, %c0_43, %c0_44] : memref<4x1x8xf32, #tpu.memory_space<vmem>>, vector<1x1x8xf32>
    %59 = vector.shape_cast %58 : vector<1x1x8xf32> to vector<1x8xf32>
    %60 = vector.broadcast %59 : vector<1x8xf32> to vector<8x8xf32>
    %61 = arith.addf %57, %60 : vector<8x8xf32>
    %c1_45 = arith.constant 1 : index
    %c0_46 = arith.constant 0 : index
    %c0_47 = arith.constant 0 : index
    %62 = vector.load %arg6[%c1_45, %c0_46, %c0_47] : memref<4x32x8xbf16, #tpu.memory_space<vmem>>, vector<1x32x8xbf16>
    %63 = vector.shape_cast %62 : vector<1x32x8xbf16> to vector<32x8xbf16>
    %cst_48 = arith.constant dense<0.000000e+00> : vector<8x8xf32>
    %64 = tpu.matmul %2, %63, %cst_48 {dimension_numbers = #tpu.dot_dimension_numbers<[1], [0], [0], [1], [0, 0, 1, 1], [], []>} : vector<8x32xbf16>, vector<32x8xbf16>, vector<8x8xf32> -> vector<8x8xf32>
    %c1_49 = arith.constant 1 : index
    %c0_50 = arith.constant 0 : index
    %c0_51 = arith.constant 0 : index
    %65 = vector.load %arg7[%c1_49, %c0_50, %c0_51] : memref<4x1x8xf32, #tpu.memory_space<vmem>>, vector<1x1x8xf32>
    %66 = vector.shape_cast %65 : vector<1x1x8xf32> to vector<1x8xf32>
    %67 = vector.broadcast %66 : vector<1x8xf32> to vector<8x8xf32>
    %68 = arith.addf %64, %67 : vector<8x8xf32>
    %cst_52 = arith.constant 0.353553385 : f32
    %69 = vector.broadcast %cst_52 : f32 to vector<8x8xf32>
    %70 = arith.mulf %54, %69 : vector<8x8xf32>
    %71 = arith.truncf %70 : vector<8x8xf32> to vector<8x8xbf16>
    %72 = arith.truncf %61 : vector<8x8xf32> to vector<8x8xbf16>
    %cst_53 = arith.constant dense<0.000000e+00> : vector<8x8xf32>
    %73 = tpu.matmul %71, %72, %cst_53 {dimension_numbers = #tpu.dot_dimension_numbers<[1], [1], [0], [0], [0, 0, 1, 0], [], []>} : vector<8x8xbf16>, vector<8x8xbf16>, vector<8x8xf32> -> vector<8x8xf32>
    %cst_54 = arith.constant dense<0xFF800000> : vector<8xf32>
    %74 = vector.multi_reduction <maximumf>, %73, %cst_54 [1] : vector<8x8xf32> to vector<8xf32>
    %75 = vector.shape_cast %74 : vector<8xf32> to vector<8x1xf32>
    %76 = vector.broadcast %75 : vector<8x1xf32> to vector<8x8xf32>
    %77 = arith.subf %73, %76 : vector<8x8xf32>
    %78 = math.exp %77 : vector<8x8xf32>
    %cst_55 = arith.constant dense<0.000000e+00> : vector<8xf32>
    %79 = vector.multi_reduction <add>, %78, %cst_55 [1] : vector<8x8xf32> to vector<8xf32>
    %80 = vector.shape_cast %79 : vector<8xf32> to vector<8x1xf32>
    %81 = tpu.reciprocal %80 {approx = true} : vector<8x1xf32> -> vector<8x1xf32>
    %82 = vector.broadcast %81 : vector<8x1xf32> to vector<8x8xf32>
    %83 = arith.mulf %78, %82 : vector<8x8xf32>
    %84 = arith.truncf %83 : vector<8x8xf32> to vector<8x8xbf16>
    %85 = arith.truncf %68 : vector<8x8xf32> to vector<8x8xbf16>
    %cst_56 = arith.constant dense<0.000000e+00> : vector<8x8xf32>
    %86 = tpu.matmul %84, %85, %cst_56 {dimension_numbers = #tpu.dot_dimension_numbers<[1], [0], [0], [1], [0, 0, 1, 1], [], []>} : vector<8x8xbf16>, vector<8x8xbf16>, vector<8x8xf32> -> vector<8x8xf32>
    %87 = arith.truncf %86 : vector<8x8xf32> to vector<8x8xbf16>
    %c1_57 = arith.constant 1 : index
    %c0_58 = arith.constant 0 : index
    %c0_59 = arith.constant 0 : index
    %88 = vector.load %arg8[%c1_57, %c0_58, %c0_59] : memref<4x8x32xbf16, #tpu.memory_space<vmem>>, vector<1x8x32xbf16>
    %89 = vector.shape_cast %88 : vector<1x8x32xbf16> to vector<8x32xbf16>
    %cst_60 = arith.constant dense<0.000000e+00> : vector<8x32xf32>
    %90 = tpu.matmul %87, %89, %cst_60 {dimension_numbers = #tpu.dot_dimension_numbers<[1], [0], [0], [1], [0, 0, 1, 1], [], []>} : vector<8x8xbf16>, vector<8x32xbf16>, vector<8x32xf32> -> vector<8x32xf32>
    %91 = arith.addf %47, %90 : vector<8x32xf32>
    %c2 = arith.constant 2 : index
    %c0_61 = arith.constant 0 : index
    %c0_62 = arith.constant 0 : index
    %92 = vector.load %arg2[%c2, %c0_61, %c0_62] : memref<4x32x8xbf16, #tpu.memory_space<vmem>>, vector<1x32x8xbf16>
    %93 = vector.shape_cast %92 : vector<1x32x8xbf16> to vector<32x8xbf16>
    %cst_63 = arith.constant dense<0.000000e+00> : vector<8x8xf32>
    %94 = tpu.matmul %2, %93, %cst_63 {dimension_numbers = #tpu.dot_dimension_numbers<[1], [0], [0], [1], [0, 0, 1, 1], [], []>} : vector<8x32xbf16>, vector<32x8xbf16>, vector<8x8xf32> -> vector<8x8xf32>
    %c2_64 = arith.constant 2 : index
    %c0_65 = arith.constant 0 : index
    %c0_66 = arith.constant 0 : index
    %95 = vector.load %arg3[%c2_64, %c0_65, %c0_66] : memref<4x1x8xf32, #tpu.memory_space<vmem>>, vector<1x1x8xf32>
    %96 = vector.shape_cast %95 : vector<1x1x8xf32> to vector<1x8xf32>
    %97 = vector.broadcast %96 : vector<1x8xf32> to vector<8x8xf32>
    %98 = arith.addf %94, %97 : vector<8x8xf32>
    %c2_67 = arith.constant 2 : index
    %c0_68 = arith.constant 0 : index
    %c0_69 = arith.constant 0 : index
    %99 = vector.load %arg4[%c2_67, %c0_68, %c0_69] : memref<4x32x8xbf16, #tpu.memory_space<vmem>>, vector<1x32x8xbf16>
    %100 = vector.shape_cast %99 : vector<1x32x8xbf16> to vector<32x8xbf16>
    %cst_70 = arith.constant dense<0.000000e+00> : vector<8x8xf32>
    %101 = tpu.matmul %2, %100, %cst_70 {dimension_numbers = #tpu.dot_dimension_numbers<[1], [0], [0], [1], [0, 0, 1, 1], [], []>} : vector<8x32xbf16>, vector<32x8xbf16>, vector<8x8xf32> -> vector<8x8xf32>
    %c2_71 = arith.constant 2 : index
    %c0_72 = arith.constant 0 : index
    %c0_73 = arith.constant 0 : index
    %102 = vector.load %arg5[%c2_71, %c0_72, %c0_73] : memref<4x1x8xf32, #tpu.memory_space<vmem>>, vector<1x1x8xf32>
    %103 = vector.shape_cast %102 : vector<1x1x8xf32> to vector<1x8xf32>
    %104 = vector.broadcast %103 : vector<1x8xf32> to vector<8x8xf32>
    %105 = arith.addf %101, %104 : vector<8x8xf32>
    %c2_74 = arith.constant 2 : index
    %c0_75 = arith.constant 0 : index
    %c0_76 = arith.constant 0 : index
    %106 = vector.load %arg6[%c2_74, %c0_75, %c0_76] : memref<4x32x8xbf16, #tpu.memory_space<vmem>>, vector<1x32x8xbf16>
    %107 = vector.shape_cast %106 : vector<1x32x8xbf16> to vector<32x8xbf16>
    %cst_77 = arith.constant dense<0.000000e+00> : vector<8x8xf32>
    %108 = tpu.matmul %2, %107, %cst_77 {dimension_numbers = #tpu.dot_dimension_numbers<[1], [0], [0], [1], [0, 0, 1, 1], [], []>} : vector<8x32xbf16>, vector<32x8xbf16>, vector<8x8xf32> -> vector<8x8xf32>
    %c2_78 = arith.constant 2 : index
    %c0_79 = arith.constant 0 : index
    %c0_80 = arith.constant 0 : index
    %109 = vector.load %arg7[%c2_78, %c0_79, %c0_80] : memref<4x1x8xf32, #tpu.memory_space<vmem>>, vector<1x1x8xf32>
    %110 = vector.shape_cast %109 : vector<1x1x8xf32> to vector<1x8xf32>
    %111 = vector.broadcast %110 : vector<1x8xf32> to vector<8x8xf32>
    %112 = arith.addf %108, %111 : vector<8x8xf32>
    %cst_81 = arith.constant 0.353553385 : f32
    %113 = vector.broadcast %cst_81 : f32 to vector<8x8xf32>
    %114 = arith.mulf %98, %113 : vector<8x8xf32>
    %115 = arith.truncf %114 : vector<8x8xf32> to vector<8x8xbf16>
    %116 = arith.truncf %105 : vector<8x8xf32> to vector<8x8xbf16>
    %cst_82 = arith.constant dense<0.000000e+00> : vector<8x8xf32>
    %117 = tpu.matmul %115, %116, %cst_82 {dimension_numbers = #tpu.dot_dimension_numbers<[1], [1], [0], [0], [0, 0, 1, 0], [], []>} : vector<8x8xbf16>, vector<8x8xbf16>, vector<8x8xf32> -> vector<8x8xf32>
    %cst_83 = arith.constant dense<0xFF800000> : vector<8xf32>
    %118 = vector.multi_reduction <maximumf>, %117, %cst_83 [1] : vector<8x8xf32> to vector<8xf32>
    %119 = vector.shape_cast %118 : vector<8xf32> to vector<8x1xf32>
    %120 = vector.broadcast %119 : vector<8x1xf32> to vector<8x8xf32>
    %121 = arith.subf %117, %120 : vector<8x8xf32>
    %122 = math.exp %121 : vector<8x8xf32>
    %cst_84 = arith.constant dense<0.000000e+00> : vector<8xf32>
    %123 = vector.multi_reduction <add>, %122, %cst_84 [1] : vector<8x8xf32> to vector<8xf32>
    %124 = vector.shape_cast %123 : vector<8xf32> to vector<8x1xf32>
    %125 = tpu.reciprocal %124 {approx = true} : vector<8x1xf32> -> vector<8x1xf32>
    %126 = vector.broadcast %125 : vector<8x1xf32> to vector<8x8xf32>
    %127 = arith.mulf %122, %126 : vector<8x8xf32>
    %128 = arith.truncf %127 : vector<8x8xf32> to vector<8x8xbf16>
    %129 = arith.truncf %112 : vector<8x8xf32> to vector<8x8xbf16>
    %cst_85 = arith.constant dense<0.000000e+00> : vector<8x8xf32>
    %130 = tpu.matmul %128, %129, %cst_85 {dimension_numbers = #tpu.dot_dimension_numbers<[1], [0], [0], [1], [0, 0, 1, 1], [], []>} : vector<8x8xbf16>, vector<8x8xbf16>, vector<8x8xf32> -> vector<8x8xf32>
    %131 = arith.truncf %130 : vector<8x8xf32> to vector<8x8xbf16>
    %c2_86 = arith.constant 2 : index
    %c0_87 = arith.constant 0 : index
    %c0_88 = arith.constant 0 : index
    %132 = vector.load %arg8[%c2_86, %c0_87, %c0_88] : memref<4x8x32xbf16, #tpu.memory_space<vmem>>, vector<1x8x32xbf16>
    %133 = vector.shape_cast %132 : vector<1x8x32xbf16> to vector<8x32xbf16>
    %cst_89 = arith.constant dense<0.000000e+00> : vector<8x32xf32>
    %134 = tpu.matmul %131, %133, %cst_89 {dimension_numbers = #tpu.dot_dimension_numbers<[1], [0], [0], [1], [0, 0, 1, 1], [], []>} : vector<8x8xbf16>, vector<8x32xbf16>, vector<8x32xf32> -> vector<8x32xf32>
    %135 = arith.addf %91, %134 : vector<8x32xf32>
    %c3 = arith.constant 3 : index
    %c0_90 = arith.constant 0 : index
    %c0_91 = arith.constant 0 : index
    %136 = vector.load %arg2[%c3, %c0_90, %c0_91] : memref<4x32x8xbf16, #tpu.memory_space<vmem>>, vector<1x32x8xbf16>
    %137 = vector.shape_cast %136 : vector<1x32x8xbf16> to vector<32x8xbf16>
    %cst_92 = arith.constant dense<0.000000e+00> : vector<8x8xf32>
    %138 = tpu.matmul %2, %137, %cst_92 {dimension_numbers = #tpu.dot_dimension_numbers<[1], [0], [0], [1], [0, 0, 1, 1], [], []>} : vector<8x32xbf16>, vector<32x8xbf16>, vector<8x8xf32> -> vector<8x8xf32>
    %c3_93 = arith.constant 3 : index
    %c0_94 = arith.constant 0 : index
    %c0_95 = arith.constant 0 : index
    %139 = vector.load %arg3[%c3_93, %c0_94, %c0_95] : memref<4x1x8xf32, #tpu.memory_space<vmem>>, vector<1x1x8xf32>
    %140 = vector.shape_cast %139 : vector<1x1x8xf32> to vector<1x8xf32>
    %141 = vector.broadcast %140 : vector<1x8xf32> to vector<8x8xf32>
    %142 = arith.addf %138, %141 : vector<8x8xf32>
    %c3_96 = arith.constant 3 : index
    %c0_97 = arith.constant 0 : index
    %c0_98 = arith.constant 0 : index
    %143 = vector.load %arg4[%c3_96, %c0_97, %c0_98] : memref<4x32x8xbf16, #tpu.memory_space<vmem>>, vector<1x32x8xbf16>
    %144 = vector.shape_cast %143 : vector<1x32x8xbf16> to vector<32x8xbf16>
    %cst_99 = arith.constant dense<0.000000e+00> : vector<8x8xf32>
    %145 = tpu.matmul %2, %144, %cst_99 {dimension_numbers = #tpu.dot_dimension_numbers<[1], [0], [0], [1], [0, 0, 1, 1], [], []>} : vector<8x32xbf16>, vector<32x8xbf16>, vector<8x8xf32> -> vector<8x8xf32>
    %c3_100 = arith.constant 3 : index
    %c0_101 = arith.constant 0 : index
    %c0_102 = arith.constant 0 : index
    %146 = vector.load %arg5[%c3_100, %c0_101, %c0_102] : memref<4x1x8xf32, #tpu.memory_space<vmem>>, vector<1x1x8xf32>
    %147 = vector.shape_cast %146 : vector<1x1x8xf32> to vector<1x8xf32>
    %148 = vector.broadcast %147 : vector<1x8xf32> to vector<8x8xf32>
    %149 = arith.addf %145, %148 : vector<8x8xf32>
    %c3_103 = arith.constant 3 : index
    %c0_104 = arith.constant 0 : index
    %c0_105 = arith.constant 0 : index
    %150 = vector.load %arg6[%c3_103, %c0_104, %c0_105] : memref<4x32x8xbf16, #tpu.memory_space<vmem>>, vector<1x32x8xbf16>
    %151 = vector.shape_cast %150 : vector<1x32x8xbf16> to vector<32x8xbf16>
    %cst_106 = arith.constant dense<0.000000e+00> : vector<8x8xf32>
    %152 = tpu.matmul %2, %151, %cst_106 {dimension_numbers = #tpu.dot_dimension_numbers<[1], [0], [0], [1], [0, 0, 1, 1], [], []>} : vector<8x32xbf16>, vector<32x8xbf16>, vector<8x8xf32> -> vector<8x8xf32>
    %c3_107 = arith.constant 3 : index
    %c0_108 = arith.constant 0 : index
    %c0_109 = arith.constant 0 : index
    %153 = vector.load %arg7[%c3_107, %c0_108, %c0_109] : memref<4x1x8xf32, #tpu.memory_space<vmem>>, vector<1x1x8xf32>
    %154 = vector.shape_cast %153 : vector<1x1x8xf32> to vector<1x8xf32>
    %155 = vector.broadcast %154 : vector<1x8xf32> to vector<8x8xf32>
    %156 = arith.addf %152, %155 : vector<8x8xf32>
    %cst_110 = arith.constant 0.353553385 : f32
    %157 = vector.broadcast %cst_110 : f32 to vector<8x8xf32>
    %158 = arith.mulf %142, %157 : vector<8x8xf32>
    %159 = arith.truncf %158 : vector<8x8xf32> to vector<8x8xbf16>
    %160 = arith.truncf %149 : vector<8x8xf32> to vector<8x8xbf16>
    %cst_111 = arith.constant dense<0.000000e+00> : vector<8x8xf32>
    %161 = tpu.matmul %159, %160, %cst_111 {dimension_numbers = #tpu.dot_dimension_numbers<[1], [1], [0], [0], [0, 0, 1, 0], [], []>} : vector<8x8xbf16>, vector<8x8xbf16>, vector<8x8xf32> -> vector<8x8xf32>
    %cst_112 = arith.constant dense<0xFF800000> : vector<8xf32>
    %162 = vector.multi_reduction <maximumf>, %161, %cst_112 [1] : vector<8x8xf32> to vector<8xf32>
    %163 = vector.shape_cast %162 : vector<8xf32> to vector<8x1xf32>
    %164 = vector.broadcast %163 : vector<8x1xf32> to vector<8x8xf32>
    %165 = arith.subf %161, %164 : vector<8x8xf32>
    %166 = math.exp %165 : vector<8x8xf32>
    %cst_113 = arith.constant dense<0.000000e+00> : vector<8xf32>
    %167 = vector.multi_reduction <add>, %166, %cst_113 [1] : vector<8x8xf32> to vector<8xf32>
    %168 = vector.shape_cast %167 : vector<8xf32> to vector<8x1xf32>
    %169 = tpu.reciprocal %168 {approx = true} : vector<8x1xf32> -> vector<8x1xf32>
    %170 = vector.broadcast %169 : vector<8x1xf32> to vector<8x8xf32>
    %171 = arith.mulf %166, %170 : vector<8x8xf32>
    %172 = arith.truncf %171 : vector<8x8xf32> to vector<8x8xbf16>
    %173 = arith.truncf %156 : vector<8x8xf32> to vector<8x8xbf16>
    %cst_114 = arith.constant dense<0.000000e+00> : vector<8x8xf32>
    %174 = tpu.matmul %172, %173, %cst_114 {dimension_numbers = #tpu.dot_dimension_numbers<[1], [0], [0], [1], [0, 0, 1, 1], [], []>} : vector<8x8xbf16>, vector<8x8xbf16>, vector<8x8xf32> -> vector<8x8xf32>
    %175 = arith.truncf %174 : vector<8x8xf32> to vector<8x8xbf16>
    %c3_115 = arith.constant 3 : index
    %c0_116 = arith.constant 0 : index
    %c0_117 = arith.constant 0 : index
    %176 = vector.load %arg8[%c3_115, %c0_116, %c0_117] : memref<4x8x32xbf16, #tpu.memory_space<vmem>>, vector<1x8x32xbf16>
    %177 = vector.shape_cast %176 : vector<1x8x32xbf16> to vector<8x32xbf16>
    %cst_118 = arith.constant dense<0.000000e+00> : vector<8x32xf32>
    %178 = tpu.matmul %175, %177, %cst_118 {dimension_numbers = #tpu.dot_dimension_numbers<[1], [0], [0], [1], [0, 0, 1, 1], [], []>} : vector<8x8xbf16>, vector<8x32xbf16>, vector<8x32xf32> -> vector<8x32xf32>
    %179 = arith.addf %135, %178 : vector<8x32xf32>
    %c0_119 = arith.constant 0 : index
    %c0_120 = arith.constant 0 : index
    %180 = vector.load %arg9[%c0_119, %c0_120] : memref<1x32xf32, #tpu.memory_space<vmem>>, vector<1x32xf32>
    %181 = vector.broadcast %180 : vector<1x32xf32> to vector<8x32xf32>
    %182 = arith.addf %179, %181 : vector<8x32xf32>
    %183 = arith.addf %1, %182 : vector<8x32xf32>
    %c0_121 = arith.constant 0 : index
    %c0_122 = arith.constant 0 : index
    %184 = vector.load %arg10[%c0_121, %c0_122] : memref<1x32xf32, #tpu.memory_space<vmem>>, vector<1x32xf32>
    %c0_123 = arith.constant 0 : index
    %c0_124 = arith.constant 0 : index
    %185 = vector.load %arg11[%c0_123, %c0_124] : memref<1x32xf32, #tpu.memory_space<vmem>>, vector<1x32xf32>
    %cst_125 = arith.constant dense<0.000000e+00> : vector<8xf32>
    %186 = vector.multi_reduction <add>, %183, %cst_125 [1] : vector<8x32xf32> to vector<8xf32>
    %187 = vector.shape_cast %186 : vector<8xf32> to vector<8x1xf32>
    %cst_126 = arith.constant 3.200000e+01 : f32
    %188 = vector.broadcast %cst_126 : f32 to vector<8x1xf32>
    %189 = arith.divf %187, %188 : vector<8x1xf32>
    %190 = vector.broadcast %189 : vector<8x1xf32> to vector<8x32xf32>
    %191 = arith.subf %183, %190 : vector<8x32xf32>
    %192 = arith.mulf %191, %191 : vector<8x32xf32>
    %cst_127 = arith.constant dense<0.000000e+00> : vector<8xf32>
    %193 = vector.multi_reduction <add>, %192, %cst_127 [1] : vector<8x32xf32> to vector<8xf32>
    %194 = vector.shape_cast %193 : vector<8xf32> to vector<8x1xf32>
    %cst_128 = arith.constant 3.200000e+01 : f32
    %195 = vector.broadcast %cst_128 : f32 to vector<8x1xf32>
    %196 = arith.divf %194, %195 : vector<8x1xf32>
    %197 = vector.broadcast %189 : vector<8x1xf32> to vector<8x32xf32>
    %198 = arith.subf %183, %197 : vector<8x32xf32>
    %cst_129 = arith.constant 9.99999974E-6 : f32
    %199 = vector.broadcast %cst_129 : f32 to vector<8x1xf32>
    %200 = arith.addf %196, %199 : vector<8x1xf32>
    %201 = math.rsqrt %200 : vector<8x1xf32>
    %202 = vector.broadcast %201 : vector<8x1xf32> to vector<8x32xf32>
    %203 = arith.mulf %198, %202 : vector<8x32xf32>
    %204 = vector.broadcast %184 : vector<1x32xf32> to vector<8x32xf32>
    %205 = arith.mulf %203, %204 : vector<8x32xf32>
    %206 = vector.broadcast %185 : vector<1x32xf32> to vector<8x32xf32>
    %207 = arith.addf %205, %206 : vector<8x32xf32>
    %208 = arith.truncf %207 : vector<8x32xf32> to vector<8x32xbf16>
    %c0_130 = arith.constant 0 : index
    %c0_131 = arith.constant 0 : index
    %209 = vector.load %arg12[%c0_130, %c0_131] : memref<32x32xbf16, #tpu.memory_space<vmem>>, vector<32x32xbf16>
    %cst_132 = arith.constant dense<0.000000e+00> : vector<8x32xf32>
    %210 = tpu.matmul %208, %209, %cst_132 {dimension_numbers = #tpu.dot_dimension_numbers<[1], [0], [0], [1], [0, 0, 1, 1], [], []>} : vector<8x32xbf16>, vector<32x32xbf16>, vector<8x32xf32> -> vector<8x32xf32>
    %c0_133 = arith.constant 0 : index
    %c0_134 = arith.constant 0 : index
    %211 = vector.load %arg13[%c0_133, %c0_134] : memref<1x32xf32, #tpu.memory_space<vmem>>, vector<1x32xf32>
    %212 = vector.broadcast %211 : vector<1x32xf32> to vector<8x32xf32>
    %213 = arith.addf %210, %212 : vector<8x32xf32>
    %cst_135 = arith.constant 0.000000e+00 : f32
    %214 = vector.broadcast %cst_135 : f32 to vector<8x32xf32>
    %215 = arith.maximumf %213, %214 : vector<8x32xf32>
    %216 = arith.addf %207, %215 : vector<8x32xf32>
    %c0_136 = arith.constant 0 : index
    %c0_137 = arith.constant 0 : index
    %217 = vector.load %arg14[%c0_136, %c0_137] : memref<1x32xf32, #tpu.memory_space<vmem>>, vector<1x32xf32>
    %c0_138 = arith.constant 0 : index
    %c0_139 = arith.constant 0 : index
    %218 = vector.load %arg15[%c0_138, %c0_139] : memref<1x32xf32, #tpu.memory_space<vmem>>, vector<1x32xf32>
    %cst_140 = arith.constant dense<0.000000e+00> : vector<8xf32>
    %219 = vector.multi_reduction <add>, %216, %cst_140 [1] : vector<8x32xf32> to vector<8xf32>
    %220 = vector.shape_cast %219 : vector<8xf32> to vector<8x1xf32>
    %cst_141 = arith.constant 3.200000e+01 : f32
    %221 = vector.broadcast %cst_141 : f32 to vector<8x1xf32>
    %222 = arith.divf %220, %221 : vector<8x1xf32>
    %223 = vector.broadcast %222 : vector<8x1xf32> to vector<8x32xf32>
    %224 = arith.subf %216, %223 : vector<8x32xf32>
    %225 = arith.mulf %224, %224 : vector<8x32xf32>
    %cst_142 = arith.constant dense<0.000000e+00> : vector<8xf32>
    %226 = vector.multi_reduction <add>, %225, %cst_142 [1] : vector<8x32xf32> to vector<8xf32>
    %227 = vector.shape_cast %226 : vector<8xf32> to vector<8x1xf32>
    %cst_143 = arith.constant 3.200000e+01 : f32
    %228 = vector.broadcast %cst_143 : f32 to vector<8x1xf32>
    %229 = arith.divf %227, %228 : vector<8x1xf32>
    %230 = vector.broadcast %222 : vector<8x1xf32> to vector<8x32xf32>
    %231 = arith.subf %216, %230 : vector<8x32xf32>
    %cst_144 = arith.constant 9.99999974E-6 : f32
    %232 = vector.broadcast %cst_144 : f32 to vector<8x1xf32>
    %233 = arith.addf %229, %232 : vector<8x1xf32>
    %234 = math.rsqrt %233 : vector<8x1xf32>
    %235 = vector.broadcast %234 : vector<8x1xf32> to vector<8x32xf32>
    %236 = arith.mulf %231, %235 : vector<8x32xf32>
    %237 = vector.broadcast %217 : vector<1x32xf32> to vector<8x32xf32>
    %238 = arith.mulf %236, %237 : vector<8x32xf32>
    %239 = vector.broadcast %218 : vector<1x32xf32> to vector<8x32xf32>
    %240 = arith.addf %238, %239 : vector<8x32xf32>
    %c0_145 = arith.constant 0 : index
    %c0_146 = arith.constant 0 : index
    %c0_147 = arith.constant 0 : index
    %241 = vector.load %arg16[%c0_145, %c0_146, %c0_147] : memref<2x8x32xf32, #tpu.memory_space<vmem>>, vector<1x8x32xf32>
    %242 = vector.shape_cast %241 : vector<1x8x32xf32> to vector<8x32xf32>
    %243 = vector.shape_cast %240 : vector<8x32xf32> to vector<1x8x32xf32>
    tpu.vector_store %arg16[%c0_145, %c0_146, %c0_147], %243 {strides = array<i32>} : memref<2x8x32xf32, #tpu.memory_space<vmem>>, vector<1x8x32xf32>,
    %c1_148 = arith.constant 1 : index
    %c0_149 = arith.constant 0 : index
    %c0_150 = arith.constant 0 : index
    %244 = vector.load %arg1[%c1_148, %c0_149, %c0_150] : memref<2x8x32xf32, #tpu.memory_space<vmem>>, vector<1x8x32xf32>
    %245 = vector.shape_cast %244 : vector<1x8x32xf32> to vector<8x32xf32>
    %246 = arith.truncf %245 : vector<8x32xf32> to vector<8x32xbf16>
    %cst_151 = arith.constant 0.000000e+00 : f32
    %247 = vector.broadcast %cst_151 : f32 to vector<8x32xf32>
    %c0_152 = arith.constant 0 : index
    %c0_153 = arith.constant 0 : index
    %c0_154 = arith.constant 0 : index
    %248 = vector.load %arg2[%c0_152, %c0_153, %c0_154] : memref<4x32x8xbf16, #tpu.memory_space<vmem>>, vector<1x32x8xbf16>
    %249 = vector.shape_cast %248 : vector<1x32x8xbf16> to vector<32x8xbf16>
    %cst_155 = arith.constant dense<0.000000e+00> : vector<8x8xf32>
    %250 = tpu.matmul %246, %249, %cst_155 {dimension_numbers = #tpu.dot_dimension_numbers<[1], [0], [0], [1], [0, 0, 1, 1], [], []>} : vector<8x32xbf16>, vector<32x8xbf16>, vector<8x8xf32> -> vector<8x8xf32>
    %c0_156 = arith.constant 0 : index
    %c0_157 = arith.constant 0 : index
    %c0_158 = arith.constant 0 : index
    %251 = vector.load %arg3[%c0_156, %c0_157, %c0_158] : memref<4x1x8xf32, #tpu.memory_space<vmem>>, vector<1x1x8xf32>
    %252 = vector.shape_cast %251 : vector<1x1x8xf32> to vector<1x8xf32>
    %253 = vector.broadcast %252 : vector<1x8xf32> to vector<8x8xf32>
    %254 = arith.addf %250, %253 : vector<8x8xf32>
    %c0_159 = arith.constant 0 : index
    %c0_160 = arith.constant 0 : index
    %c0_161 = arith.constant 0 : index
    %255 = vector.load %arg4[%c0_159, %c0_160, %c0_161] : memref<4x32x8xbf16, #tpu.memory_space<vmem>>, vector<1x32x8xbf16>
    %256 = vector.shape_cast %255 : vector<1x32x8xbf16> to vector<32x8xbf16>
    %cst_162 = arith.constant dense<0.000000e+00> : vector<8x8xf32>
    %257 = tpu.matmul %246, %256, %cst_162 {dimension_numbers = #tpu.dot_dimension_numbers<[1], [0], [0], [1], [0, 0, 1, 1], [], []>} : vector<8x32xbf16>, vector<32x8xbf16>, vector<8x8xf32> -> vector<8x8xf32>
    %c0_163 = arith.constant 0 : index
    %c0_164 = arith.constant 0 : index
    %c0_165 = arith.constant 0 : index
    %258 = vector.load %arg5[%c0_163, %c0_164, %c0_165] : memref<4x1x8xf32, #tpu.memory_space<vmem>>, vector<1x1x8xf32>
    %259 = vector.shape_cast %258 : vector<1x1x8xf32> to vector<1x8xf32>
    %260 = vector.broadcast %259 : vector<1x8xf32> to vector<8x8xf32>
    %261 = arith.addf %257, %260 : vector<8x8xf32>
    %c0_166 = arith.constant 0 : index
    %c0_167 = arith.constant 0 : index
    %c0_168 = arith.constant 0 : index
    %262 = vector.load %arg6[%c0_166, %c0_167, %c0_168] : memref<4x32x8xbf16, #tpu.memory_space<vmem>>, vector<1x32x8xbf16>
    %263 = vector.shape_cast %262 : vector<1x32x8xbf16> to vector<32x8xbf16>
    %cst_169 = arith.constant dense<0.000000e+00> : vector<8x8xf32>
    %264 = tpu.matmul %246, %263, %cst_169 {dimension_numbers = #tpu.dot_dimension_numbers<[1], [0], [0], [1], [0, 0, 1, 1], [], []>} : vector<8x32xbf16>, vector<32x8xbf16>, vector<8x8xf32> -> vector<8x8xf32>
    %c0_170 = arith.constant 0 : index
    %c0_171 = arith.constant 0 : index
    %c0_172 = arith.constant 0 : index
    %265 = vector.load %arg7[%c0_170, %c0_171, %c0_172] : memref<4x1x8xf32, #tpu.memory_space<vmem>>, vector<1x1x8xf32>
    %266 = vector.shape_cast %265 : vector<1x1x8xf32> to vector<1x8xf32>
    %267 = vector.broadcast %266 : vector<1x8xf32> to vector<8x8xf32>
    %268 = arith.addf %264, %267 : vector<8x8xf32>
    %cst_173 = arith.constant 0.353553385 : f32
    %269 = vector.broadcast %cst_173 : f32 to vector<8x8xf32>
    %270 = arith.mulf %254, %269 : vector<8x8xf32>
    %271 = arith.truncf %270 : vector<8x8xf32> to vector<8x8xbf16>
    %272 = arith.truncf %261 : vector<8x8xf32> to vector<8x8xbf16>
    %cst_174 = arith.constant dense<0.000000e+00> : vector<8x8xf32>
    %273 = tpu.matmul %271, %272, %cst_174 {dimension_numbers = #tpu.dot_dimension_numbers<[1], [1], [0], [0], [0, 0, 1, 0], [], []>} : vector<8x8xbf16>, vector<8x8xbf16>, vector<8x8xf32> -> vector<8x8xf32>
    %cst_175 = arith.constant dense<0xFF800000> : vector<8xf32>
    %274 = vector.multi_reduction <maximumf>, %273, %cst_175 [1] : vector<8x8xf32> to vector<8xf32>
    %275 = vector.shape_cast %274 : vector<8xf32> to vector<8x1xf32>
    %276 = vector.broadcast %275 : vector<8x1xf32> to vector<8x8xf32>
    %277 = arith.subf %273, %276 : vector<8x8xf32>
    %278 = math.exp %277 : vector<8x8xf32>
    %cst_176 = arith.constant dense<0.000000e+00> : vector<8xf32>
    %279 = vector.multi_reduction <add>, %278, %cst_176 [1] : vector<8x8xf32> to vector<8xf32>
    %280 = vector.shape_cast %279 : vector<8xf32> to vector<8x1xf32>
    %281 = tpu.reciprocal %280 {approx = true} : vector<8x1xf32> -> vector<8x1xf32>
    %282 = vector.broadcast %281 : vector<8x1xf32> to vector<8x8xf32>
    %283 = arith.mulf %278, %282 : vector<8x8xf32>
    %284 = arith.truncf %283 : vector<8x8xf32> to vector<8x8xbf16>
    %285 = arith.truncf %268 : vector<8x8xf32> to vector<8x8xbf16>
    %cst_177 = arith.constant dense<0.000000e+00> : vector<8x8xf32>
    %286 = tpu.matmul %284, %285, %cst_177 {dimension_numbers = #tpu.dot_dimension_numbers<[1], [0], [0], [1], [0, 0, 1, 1], [], []>} : vector<8x8xbf16>, vector<8x8xbf16>, vector<8x8xf32> -> vector<8x8xf32>
    %287 = arith.truncf %286 : vector<8x8xf32> to vector<8x8xbf16>
    %c0_178 = arith.constant 0 : index
    %c0_179 = arith.constant 0 : index
    %c0_180 = arith.constant 0 : index
    %288 = vector.load %arg8[%c0_178, %c0_179, %c0_180] : memref<4x8x32xbf16, #tpu.memory_space<vmem>>, vector<1x8x32xbf16>
    %289 = vector.shape_cast %288 : vector<1x8x32xbf16> to vector<8x32xbf16>
    %cst_181 = arith.constant dense<0.000000e+00> : vector<8x32xf32>
    %290 = tpu.matmul %287, %289, %cst_181 {dimension_numbers = #tpu.dot_dimension_numbers<[1], [0], [0], [1], [0, 0, 1, 1], [], []>} : vector<8x8xbf16>, vector<8x32xbf16>, vector<8x32xf32> -> vector<8x32xf32>
    %291 = arith.addf %247, %290 : vector<8x32xf32>
    %c1_182 = arith.constant 1 : index
    %c0_183 = arith.constant 0 : index
    %c0_184 = arith.constant 0 : index
    %292 = vector.load %arg2[%c1_182, %c0_183, %c0_184] : memref<4x32x8xbf16, #tpu.memory_space<vmem>>, vector<1x32x8xbf16>
    %293 = vector.shape_cast %292 : vector<1x32x8xbf16> to vector<32x8xbf16>
    %cst_185 = arith.constant dense<0.000000e+00> : vector<8x8xf32>
    %294 = tpu.matmul %246, %293, %cst_185 {dimension_numbers = #tpu.dot_dimension_numbers<[1], [0], [0], [1], [0, 0, 1, 1], [], []>} : vector<8x32xbf16>, vector<32x8xbf16>, vector<8x8xf32> -> vector<8x8xf32>
    %c1_186 = arith.constant 1 : index
    %c0_187 = arith.constant 0 : index
    %c0_188 = arith.constant 0 : index
    %295 = vector.load %arg3[%c1_186, %c0_187, %c0_188] : memref<4x1x8xf32, #tpu.memory_space<vmem>>, vector<1x1x8xf32>
    %296 = vector.shape_cast %295 : vector<1x1x8xf32> to vector<1x8xf32>
    %297 = vector.broadcast %296 : vector<1x8xf32> to vector<8x8xf32>
    %298 = arith.addf %294, %297 : vector<8x8xf32>
    %c1_189 = arith.constant 1 : index
    %c0_190 = arith.constant 0 : index
    %c0_191 = arith.constant 0 : index
    %299 = vector.load %arg4[%c1_189, %c0_190, %c0_191] : memref<4x32x8xbf16, #tpu.memory_space<vmem>>, vector<1x32x8xbf16>
    %300 = vector.shape_cast %299 : vector<1x32x8xbf16> to vector<32x8xbf16>
    %cst_192 = arith.constant dense<0.000000e+00> : vector<8x8xf32>
    %301 = tpu.matmul %246, %300, %cst_192 {dimension_numbers = #tpu.dot_dimension_numbers<[1], [0], [0], [1], [0, 0, 1, 1], [], []>} : vector<8x32xbf16>, vector<32x8xbf16>, vector<8x8xf32> -> vector<8x8xf32>
    %c1_193 = arith.constant 1 : index
    %c0_194 = arith.constant 0 : index
    %c0_195 = arith.constant 0 : index
    %302 = vector.load %arg5[%c1_193, %c0_194, %c0_195] : memref<4x1x8xf32, #tpu.memory_space<vmem>>, vector<1x1x8xf32>
    %303 = vector.shape_cast %302 : vector<1x1x8xf32> to vector<1x8xf32>
    %304 = vector.broadcast %303 : vector<1x8xf32> to vector<8x8xf32>
    %305 = arith.addf %301, %304 : vector<8x8xf32>
    %c1_196 = arith.constant 1 : index
    %c0_197 = arith.constant 0 : index
    %c0_198 = arith.constant 0 : index
    %306 = vector.load %arg6[%c1_196, %c0_197, %c0_198] : memref<4x32x8xbf16, #tpu.memory_space<vmem>>, vector<1x32x8xbf16>
    %307 = vector.shape_cast %306 : vector<1x32x8xbf16> to vector<32x8xbf16>
    %cst_199 = arith.constant dense<0.000000e+00> : vector<8x8xf32>
    %308 = tpu.matmul %246, %307, %cst_199 {dimension_numbers = #tpu.dot_dimension_numbers<[1], [0], [0], [1], [0, 0, 1, 1], [], []>} : vector<8x32xbf16>, vector<32x8xbf16>, vector<8x8xf32> -> vector<8x8xf32>
    %c1_200 = arith.constant 1 : index
    %c0_201 = arith.constant 0 : index
    %c0_202 = arith.constant 0 : index
    %309 = vector.load %arg7[%c1_200, %c0_201, %c0_202] : memref<4x1x8xf32, #tpu.memory_space<vmem>>, vector<1x1x8xf32>
    %310 = vector.shape_cast %309 : vector<1x1x8xf32> to vector<1x8xf32>
    %311 = vector.broadcast %310 : vector<1x8xf32> to vector<8x8xf32>
    %312 = arith.addf %308, %311 : vector<8x8xf32>
    %cst_203 = arith.constant 0.353553385 : f32
    %313 = vector.broadcast %cst_203 : f32 to vector<8x8xf32>
    %314 = arith.mulf %298, %313 : vector<8x8xf32>
    %315 = arith.truncf %314 : vector<8x8xf32> to vector<8x8xbf16>
    %316 = arith.truncf %305 : vector<8x8xf32> to vector<8x8xbf16>
    %cst_204 = arith.constant dense<0.000000e+00> : vector<8x8xf32>
    %317 = tpu.matmul %315, %316, %cst_204 {dimension_numbers = #tpu.dot_dimension_numbers<[1], [1], [0], [0], [0, 0, 1, 0], [], []>} : vector<8x8xbf16>, vector<8x8xbf16>, vector<8x8xf32> -> vector<8x8xf32>
    %cst_205 = arith.constant dense<0xFF800000> : vector<8xf32>
    %318 = vector.multi_reduction <maximumf>, %317, %cst_205 [1] : vector<8x8xf32> to vector<8xf32>
    %319 = vector.shape_cast %318 : vector<8xf32> to vector<8x1xf32>
    %320 = vector.broadcast %319 : vector<8x1xf32> to vector<8x8xf32>
    %321 = arith.subf %317, %320 : vector<8x8xf32>
    %322 = math.exp %321 : vector<8x8xf32>
    %cst_206 = arith.constant dense<0.000000e+00> : vector<8xf32>
    %323 = vector.multi_reduction <add>, %322, %cst_206 [1] : vector<8x8xf32> to vector<8xf32>
    %324 = vector.shape_cast %323 : vector<8xf32> to vector<8x1xf32>
    %325 = tpu.reciprocal %324 {approx = true} : vector<8x1xf32> -> vector<8x1xf32>
    %326 = vector.broadcast %325 : vector<8x1xf32> to vector<8x8xf32>
    %327 = arith.mulf %322, %326 : vector<8x8xf32>
    %328 = arith.truncf %327 : vector<8x8xf32> to vector<8x8xbf16>
    %329 = arith.truncf %312 : vector<8x8xf32> to vector<8x8xbf16>
    %cst_207 = arith.constant dense<0.000000e+00> : vector<8x8xf32>
    %330 = tpu.matmul %328, %329, %cst_207 {dimension_numbers = #tpu.dot_dimension_numbers<[1], [0], [0], [1], [0, 0, 1, 1], [], []>} : vector<8x8xbf16>, vector<8x8xbf16>, vector<8x8xf32> -> vector<8x8xf32>
    %331 = arith.truncf %330 : vector<8x8xf32> to vector<8x8xbf16>
    %c1_208 = arith.constant 1 : index
    %c0_209 = arith.constant 0 : index
    %c0_210 = arith.constant 0 : index
    %332 = vector.load %arg8[%c1_208, %c0_209, %c0_210] : memref<4x8x32xbf16, #tpu.memory_space<vmem>>, vector<1x8x32xbf16>
    %333 = vector.shape_cast %332 : vector<1x8x32xbf16> to vector<8x32xbf16>
    %cst_211 = arith.constant dense<0.000000e+00> : vector<8x32xf32>
    %334 = tpu.matmul %331, %333, %cst_211 {dimension_numbers = #tpu.dot_dimension_numbers<[1], [0], [0], [1], [0, 0, 1, 1], [], []>} : vector<8x8xbf16>, vector<8x32xbf16>, vector<8x32xf32> -> vector<8x32xf32>
    %335 = arith.addf %291, %334 : vector<8x32xf32>
    %c2_212 = arith.constant 2 : index
    %c0_213 = arith.constant 0 : index
    %c0_214 = arith.constant 0 : index
    %336 = vector.load %arg2[%c2_212, %c0_213, %c0_214] : memref<4x32x8xbf16, #tpu.memory_space<vmem>>, vector<1x32x8xbf16>
    %337 = vector.shape_cast %336 : vector<1x32x8xbf16> to vector<32x8xbf16>
    %cst_215 = arith.constant dense<0.000000e+00> : vector<8x8xf32>
    %338 = tpu.matmul %246, %337, %cst_215 {dimension_numbers = #tpu.dot_dimension_numbers<[1], [0], [0], [1], [0, 0, 1, 1], [], []>} : vector<8x32xbf16>, vector<32x8xbf16>, vector<8x8xf32> -> vector<8x8xf32>
    %c2_216 = arith.constant 2 : index
    %c0_217 = arith.constant 0 : index
    %c0_218 = arith.constant 0 : index
    %339 = vector.load %arg3[%c2_216, %c0_217, %c0_218] : memref<4x1x8xf32, #tpu.memory_space<vmem>>, vector<1x1x8xf32>
    %340 = vector.shape_cast %339 : vector<1x1x8xf32> to vector<1x8xf32>
    %341 = vector.broadcast %340 : vector<1x8xf32> to vector<8x8xf32>
    %342 = arith.addf %338, %341 : vector<8x8xf32>
    %c2_219 = arith.constant 2 : index
    %c0_220 = arith.constant 0 : index
    %c0_221 = arith.constant 0 : index
    %343 = vector.load %arg4[%c2_219, %c0_220, %c0_221] : memref<4x32x8xbf16, #tpu.memory_space<vmem>>, vector<1x32x8xbf16>
    %344 = vector.shape_cast %343 : vector<1x32x8xbf16> to vector<32x8xbf16>
    %cst_222 = arith.constant dense<0.000000e+00> : vector<8x8xf32>
    %345 = tpu.matmul %246, %344, %cst_222 {dimension_numbers = #tpu.dot_dimension_numbers<[1], [0], [0], [1], [0, 0, 1, 1], [], []>} : vector<8x32xbf16>, vector<32x8xbf16>, vector<8x8xf32> -> vector<8x8xf32>
    %c2_223 = arith.constant 2 : index
    %c0_224 = arith.constant 0 : index
    %c0_225 = arith.constant 0 : index
    %346 = vector.load %arg5[%c2_223, %c0_224, %c0_225] : memref<4x1x8xf32, #tpu.memory_space<vmem>>, vector<1x1x8xf32>
    %347 = vector.shape_cast %346 : vector<1x1x8xf32> to vector<1x8xf32>
    %348 = vector.broadcast %347 : vector<1x8xf32> to vector<8x8xf32>
    %349 = arith.addf %345, %348 : vector<8x8xf32>
    %c2_226 = arith.constant 2 : index
    %c0_227 = arith.constant 0 : index
    %c0_228 = arith.constant 0 : index
    %350 = vector.load %arg6[%c2_226, %c0_227, %c0_228] : memref<4x32x8xbf16, #tpu.memory_space<vmem>>, vector<1x32x8xbf16>
    %351 = vector.shape_cast %350 : vector<1x32x8xbf16> to vector<32x8xbf16>
    %cst_229 = arith.constant dense<0.000000e+00> : vector<8x8xf32>
    %352 = tpu.matmul %246, %351, %cst_229 {dimension_numbers = #tpu.dot_dimension_numbers<[1], [0], [0], [1], [0, 0, 1, 1], [], []>} : vector<8x32xbf16>, vector<32x8xbf16>, vector<8x8xf32> -> vector<8x8xf32>
    %c2_230 = arith.constant 2 : index
    %c0_231 = arith.constant 0 : index
    %c0_232 = arith.constant 0 : index
    %353 = vector.load %arg7[%c2_230, %c0_231, %c0_232] : memref<4x1x8xf32, #tpu.memory_space<vmem>>, vector<1x1x8xf32>
    %354 = vector.shape_cast %353 : vector<1x1x8xf32> to vector<1x8xf32>
    %355 = vector.broadcast %354 : vector<1x8xf32> to vector<8x8xf32>
    %356 = arith.addf %352, %355 : vector<8x8xf32>
    %cst_233 = arith.constant 0.353553385 : f32
    %357 = vector.broadcast %cst_233 : f32 to vector<8x8xf32>
    %358 = arith.mulf %342, %357 : vector<8x8xf32>
    %359 = arith.truncf %358 : vector<8x8xf32> to vector<8x8xbf16>
    %360 = arith.truncf %349 : vector<8x8xf32> to vector<8x8xbf16>
    %cst_234 = arith.constant dense<0.000000e+00> : vector<8x8xf32>
    %361 = tpu.matmul %359, %360, %cst_234 {dimension_numbers = #tpu.dot_dimension_numbers<[1], [1], [0], [0], [0, 0, 1, 0], [], []>} : vector<8x8xbf16>, vector<8x8xbf16>, vector<8x8xf32> -> vector<8x8xf32>
    %cst_235 = arith.constant dense<0xFF800000> : vector<8xf32>
    %362 = vector.multi_reduction <maximumf>, %361, %cst_235 [1] : vector<8x8xf32> to vector<8xf32>
    %363 = vector.shape_cast %362 : vector<8xf32> to vector<8x1xf32>
    %364 = vector.broadcast %363 : vector<8x1xf32> to vector<8x8xf32>
    %365 = arith.subf %361, %364 : vector<8x8xf32>
    %366 = math.exp %365 : vector<8x8xf32>
    %cst_236 = arith.constant dense<0.000000e+00> : vector<8xf32>
    %367 = vector.multi_reduction <add>, %366, %cst_236 [1] : vector<8x8xf32> to vector<8xf32>
    %368 = vector.shape_cast %367 : vector<8xf32> to vector<8x1xf32>
    %369 = tpu.reciprocal %368 {approx = true} : vector<8x1xf32> -> vector<8x1xf32>
    %370 = vector.broadcast %369 : vector<8x1xf32> to vector<8x8xf32>
    %371 = arith.mulf %366, %370 : vector<8x8xf32>
    %372 = arith.truncf %371 : vector<8x8xf32> to vector<8x8xbf16>
    %373 = arith.truncf %356 : vector<8x8xf32> to vector<8x8xbf16>
    %cst_237 = arith.constant dense<0.000000e+00> : vector<8x8xf32>
    %374 = tpu.matmul %372, %373, %cst_237 {dimension_numbers = #tpu.dot_dimension_numbers<[1], [0], [0], [1], [0, 0, 1, 1], [], []>} : vector<8x8xbf16>, vector<8x8xbf16>, vector<8x8xf32> -> vector<8x8xf32>
    %375 = arith.truncf %374 : vector<8x8xf32> to vector<8x8xbf16>
    %c2_238 = arith.constant 2 : index
    %c0_239 = arith.constant 0 : index
    %c0_240 = arith.constant 0 : index
    %376 = vector.load %arg8[%c2_238, %c0_239, %c0_240] : memref<4x8x32xbf16, #tpu.memory_space<vmem>>, vector<1x8x32xbf16>
    %377 = vector.shape_cast %376 : vector<1x8x32xbf16> to vector<8x32xbf16>
    %cst_241 = arith.constant dense<0.000000e+00> : vector<8x32xf32>
    %378 = tpu.matmul %375, %377, %cst_241 {dimension_numbers = #tpu.dot_dimension_numbers<[1], [0], [0], [1], [0, 0, 1, 1], [], []>} : vector<8x8xbf16>, vector<8x32xbf16>, vector<8x32xf32> -> vector<8x32xf32>
    %379 = arith.addf %335, %378 : vector<8x32xf32>
    %c3_242 = arith.constant 3 : index
    %c0_243 = arith.constant 0 : index
    %c0_244 = arith.constant 0 : index
    %380 = vector.load %arg2[%c3_242, %c0_243, %c0_244] : memref<4x32x8xbf16, #tpu.memory_space<vmem>>, vector<1x32x8xbf16>
    %381 = vector.shape_cast %380 : vector<1x32x8xbf16> to vector<32x8xbf16>
    %cst_245 = arith.constant dense<0.000000e+00> : vector<8x8xf32>
    %382 = tpu.matmul %246, %381, %cst_245 {dimension_numbers = #tpu.dot_dimension_numbers<[1], [0], [0], [1], [0, 0, 1, 1], [], []>} : vector<8x32xbf16>, vector<32x8xbf16>, vector<8x8xf32> -> vector<8x8xf32>
    %c3_246 = arith.constant 3 : index
    %c0_247 = arith.constant 0 : index
    %c0_248 = arith.constant 0 : index
    %383 = vector.load %arg3[%c3_246, %c0_247, %c0_248] : memref<4x1x8xf32, #tpu.memory_space<vmem>>, vector<1x1x8xf32>
    %384 = vector.shape_cast %383 : vector<1x1x8xf32> to vector<1x8xf32>
    %385 = vector.broadcast %384 : vector<1x8xf32> to vector<8x8xf32>
    %386 = arith.addf %382, %385 : vector<8x8xf32>
    %c3_249 = arith.constant 3 : index
    %c0_250 = arith.constant 0 : index
    %c0_251 = arith.constant 0 : index
    %387 = vector.load %arg4[%c3_249, %c0_250, %c0_251] : memref<4x32x8xbf16, #tpu.memory_space<vmem>>, vector<1x32x8xbf16>
    %388 = vector.shape_cast %387 : vector<1x32x8xbf16> to vector<32x8xbf16>
    %cst_252 = arith.constant dense<0.000000e+00> : vector<8x8xf32>
    %389 = tpu.matmul %246, %388, %cst_252 {dimension_numbers = #tpu.dot_dimension_numbers<[1], [0], [0], [1], [0, 0, 1, 1], [], []>} : vector<8x32xbf16>, vector<32x8xbf16>, vector<8x8xf32> -> vector<8x8xf32>
    %c3_253 = arith.constant 3 : index
    %c0_254 = arith.constant 0 : index
    %c0_255 = arith.constant 0 : index
    %390 = vector.load %arg5[%c3_253, %c0_254, %c0_255] : memref<4x1x8xf32, #tpu.memory_space<vmem>>, vector<1x1x8xf32>
    %391 = vector.shape_cast %390 : vector<1x1x8xf32> to vector<1x8xf32>
    %392 = vector.broadcast %391 : vector<1x8xf32> to vector<8x8xf32>
    %393 = arith.addf %389, %392 : vector<8x8xf32>
    %c3_256 = arith.constant 3 : index
    %c0_257 = arith.constant 0 : index
    %c0_258 = arith.constant 0 : index
    %394 = vector.load %arg6[%c3_256, %c0_257, %c0_258] : memref<4x32x8xbf16, #tpu.memory_space<vmem>>, vector<1x32x8xbf16>
    %395 = vector.shape_cast %394 : vector<1x32x8xbf16> to vector<32x8xbf16>
    %cst_259 = arith.constant dense<0.000000e+00> : vector<8x8xf32>
    %396 = tpu.matmul %246, %395, %cst_259 {dimension_numbers = #tpu.dot_dimension_numbers<[1], [0], [0], [1], [0, 0, 1, 1], [], []>} : vector<8x32xbf16>, vector<32x8xbf16>, vector<8x8xf32> -> vector<8x8xf32>
    %c3_260 = arith.constant 3 : index
    %c0_261 = arith.constant 0 : index
    %c0_262 = arith.constant 0 : index
    %397 = vector.load %arg7[%c3_260, %c0_261, %c0_262] : memref<4x1x8xf32, #tpu.memory_space<vmem>>, vector<1x1x8xf32>
    %398 = vector.shape_cast %397 : vector<1x1x8xf32> to vector<1x8xf32>
    %399 = vector.broadcast %398 : vector<1x8xf32> to vector<8x8xf32>
    %400 = arith.addf %396, %399 : vector<8x8xf32>
    %cst_263 = arith.constant 0.353553385 : f32
    %401 = vector.broadcast %cst_263 : f32 to vector<8x8xf32>
    %402 = arith.mulf %386, %401 : vector<8x8xf32>
    %403 = arith.truncf %402 : vector<8x8xf32> to vector<8x8xbf16>
    %404 = arith.truncf %393 : vector<8x8xf32> to vector<8x8xbf16>
    %cst_264 = arith.constant dense<0.000000e+00> : vector<8x8xf32>
    %405 = tpu.matmul %403, %404, %cst_264 {dimension_numbers = #tpu.dot_dimension_numbers<[1], [1], [0], [0], [0, 0, 1, 0], [], []>} : vector<8x8xbf16>, vector<8x8xbf16>, vector<8x8xf32> -> vector<8x8xf32>
    %cst_265 = arith.constant dense<0xFF800000> : vector<8xf32>
    %406 = vector.multi_reduction <maximumf>, %405, %cst_265 [1] : vector<8x8xf32> to vector<8xf32>
    %407 = vector.shape_cast %406 : vector<8xf32> to vector<8x1xf32>
    %408 = vector.broadcast %407 : vector<8x1xf32> to vector<8x8xf32>
    %409 = arith.subf %405, %408 : vector<8x8xf32>
    %410 = math.exp %409 : vector<8x8xf32>
    %cst_266 = arith.constant dense<0.000000e+00> : vector<8xf32>
    %411 = vector.multi_reduction <add>, %410, %cst_266 [1] : vector<8x8xf32> to vector<8xf32>
    %412 = vector.shape_cast %411 : vector<8xf32> to vector<8x1xf32>
    %413 = tpu.reciprocal %412 {approx = true} : vector<8x1xf32> -> vector<8x1xf32>
    %414 = vector.broadcast %413 : vector<8x1xf32> to vector<8x8xf32>
    %415 = arith.mulf %410, %414 : vector<8x8xf32>
    %416 = arith.truncf %415 : vector<8x8xf32> to vector<8x8xbf16>
    %417 = arith.truncf %400 : vector<8x8xf32> to vector<8x8xbf16>
    %cst_267 = arith.constant dense<0.000000e+00> : vector<8x8xf32>
    %418 = tpu.matmul %416, %417, %cst_267 {dimension_numbers = #tpu.dot_dimension_numbers<[1], [0], [0], [1], [0, 0, 1, 1], [], []>} : vector<8x8xbf16>, vector<8x8xbf16>, vector<8x8xf32> -> vector<8x8xf32>
    %419 = arith.truncf %418 : vector<8x8xf32> to vector<8x8xbf16>
    %c3_268 = arith.constant 3 : index
    %c0_269 = arith.constant 0 : index
    %c0_270 = arith.constant 0 : index
    %420 = vector.load %arg8[%c3_268, %c0_269, %c0_270] : memref<4x8x32xbf16, #tpu.memory_space<vmem>>, vector<1x8x32xbf16>
    %421 = vector.shape_cast %420 : vector<1x8x32xbf16> to vector<8x32xbf16>
    %cst_271 = arith.constant dense<0.000000e+00> : vector<8x32xf32>
    %422 = tpu.matmul %419, %421, %cst_271 {dimension_numbers = #tpu.dot_dimension_numbers<[1], [0], [0], [1], [0, 0, 1, 1], [], []>} : vector<8x8xbf16>, vector<8x32xbf16>, vector<8x32xf32> -> vector<8x32xf32>
    %423 = arith.addf %379, %422 : vector<8x32xf32>
    %c0_272 = arith.constant 0 : index
    %c0_273 = arith.constant 0 : index
    %424 = vector.load %arg9[%c0_272, %c0_273] : memref<1x32xf32, #tpu.memory_space<vmem>>, vector<1x32xf32>
    %425 = vector.broadcast %424 : vector<1x32xf32> to vector<8x32xf32>
    %426 = arith.addf %423, %425 : vector<8x32xf32>
    %427 = arith.addf %245, %426 : vector<8x32xf32>
    %c0_274 = arith.constant 0 : index
    %c0_275 = arith.constant 0 : index
    %428 = vector.load %arg10[%c0_274, %c0_275] : memref<1x32xf32, #tpu.memory_space<vmem>>, vector<1x32xf32>
    %c0_276 = arith.constant 0 : index
    %c0_277 = arith.constant 0 : index
    %429 = vector.load %arg11[%c0_276, %c0_277] : memref<1x32xf32, #tpu.memory_space<vmem>>, vector<1x32xf32>
    %cst_278 = arith.constant dense<0.000000e+00> : vector<8xf32>
    %430 = vector.multi_reduction <add>, %427, %cst_278 [1] : vector<8x32xf32> to vector<8xf32>
    %431 = vector.shape_cast %430 : vector<8xf32> to vector<8x1xf32>
    %cst_279 = arith.constant 3.200000e+01 : f32
    %432 = vector.broadcast %cst_279 : f32 to vector<8x1xf32>
    %433 = arith.divf %431, %432 : vector<8x1xf32>
    %434 = vector.broadcast %433 : vector<8x1xf32> to vector<8x32xf32>
    %435 = arith.subf %427, %434 : vector<8x32xf32>
    %436 = arith.mulf %435, %435 : vector<8x32xf32>
    %cst_280 = arith.constant dense<0.000000e+00> : vector<8xf32>
    %437 = vector.multi_reduction <add>, %436, %cst_280 [1] : vector<8x32xf32> to vector<8xf32>
    %438 = vector.shape_cast %437 : vector<8xf32> to vector<8x1xf32>
    %cst_281 = arith.constant 3.200000e+01 : f32
    %439 = vector.broadcast %cst_281 : f32 to vector<8x1xf32>
    %440 = arith.divf %438, %439 : vector<8x1xf32>
    %441 = vector.broadcast %433 : vector<8x1xf32> to vector<8x32xf32>
    %442 = arith.subf %427, %441 : vector<8x32xf32>
    %cst_282 = arith.constant 9.99999974E-6 : f32
    %443 = vector.broadcast %cst_282 : f32 to vector<8x1xf32>
    %444 = arith.addf %440, %443 : vector<8x1xf32>
    %445 = math.rsqrt %444 : vector<8x1xf32>
    %446 = vector.broadcast %445 : vector<8x1xf32> to vector<8x32xf32>
    %447 = arith.mulf %442, %446 : vector<8x32xf32>
    %448 = vector.broadcast %428 : vector<1x32xf32> to vector<8x32xf32>
    %449 = arith.mulf %447, %448 : vector<8x32xf32>
    %450 = vector.broadcast %429 : vector<1x32xf32> to vector<8x32xf32>
    %451 = arith.addf %449, %450 : vector<8x32xf32>
    %452 = arith.truncf %451 : vector<8x32xf32> to vector<8x32xbf16>
    %c0_283 = arith.constant 0 : index
    %c0_284 = arith.constant 0 : index
    %453 = vector.load %arg12[%c0_283, %c0_284] : memref<32x32xbf16, #tpu.memory_space<vmem>>, vector<32x32xbf16>
    %cst_285 = arith.constant dense<0.000000e+00> : vector<8x32xf32>
    %454 = tpu.matmul %452, %453, %cst_285 {dimension_numbers = #tpu.dot_dimension_numbers<[1], [0], [0], [1], [0, 0, 1, 1], [], []>} : vector<8x32xbf16>, vector<32x32xbf16>, vector<8x32xf32> -> vector<8x32xf32>
    %c0_286 = arith.constant 0 : index
    %c0_287 = arith.constant 0 : index
    %455 = vector.load %arg13[%c0_286, %c0_287] : memref<1x32xf32, #tpu.memory_space<vmem>>, vector<1x32xf32>
    %456 = vector.broadcast %455 : vector<1x32xf32> to vector<8x32xf32>
    %457 = arith.addf %454, %456 : vector<8x32xf32>
    %cst_288 = arith.constant 0.000000e+00 : f32
    %458 = vector.broadcast %cst_288 : f32 to vector<8x32xf32>
    %459 = arith.maximumf %457, %458 : vector<8x32xf32>
    %460 = arith.addf %451, %459 : vector<8x32xf32>
    %c0_289 = arith.constant 0 : index
    %c0_290 = arith.constant 0 : index
    %461 = vector.load %arg14[%c0_289, %c0_290] : memref<1x32xf32, #tpu.memory_space<vmem>>, vector<1x32xf32>
    %c0_291 = arith.constant 0 : index
    %c0_292 = arith.constant 0 : index
    %462 = vector.load %arg15[%c0_291, %c0_292] : memref<1x32xf32, #tpu.memory_space<vmem>>, vector<1x32xf32>
    %cst_293 = arith.constant dense<0.000000e+00> : vector<8xf32>
    %463 = vector.multi_reduction <add>, %460, %cst_293 [1] : vector<8x32xf32> to vector<8xf32>
    %464 = vector.shape_cast %463 : vector<8xf32> to vector<8x1xf32>
    %cst_294 = arith.constant 3.200000e+01 : f32
    %465 = vector.broadcast %cst_294 : f32 to vector<8x1xf32>
    %466 = arith.divf %464, %465 : vector<8x1xf32>
    %467 = vector.broadcast %466 : vector<8x1xf32> to vector<8x32xf32>
    %468 = arith.subf %460, %467 : vector<8x32xf32>
    %469 = arith.mulf %468, %468 : vector<8x32xf32>
    %cst_295 = arith.constant dense<0.000000e+00> : vector<8xf32>
    %470 = vector.multi_reduction <add>, %469, %cst_295 [1] : vector<8x32xf32> to vector<8xf32>
    %471 = vector.shape_cast %470 : vector<8xf32> to vector<8x1xf32>
    %cst_296 = arith.constant 3.200000e+01 : f32
    %472 = vector.broadcast %cst_296 : f32 to vector<8x1xf32>
    %473 = arith.divf %471, %472 : vector<8x1xf32>
    %474 = vector.broadcast %466 : vector<8x1xf32> to vector<8x32xf32>
    %475 = arith.subf %460, %474 : vector<8x32xf32>
    %cst_297 = arith.constant 9.99999974E-6 : f32
    %476 = vector.broadcast %cst_297 : f32 to vector<8x1xf32>
    %477 = arith.addf %473, %476 : vector<8x1xf32>
    %478 = math.rsqrt %477 : vector<8x1xf32>
    %479 = vector.broadcast %478 : vector<8x1xf32> to vector<8x32xf32>
    %480 = arith.mulf %475, %479 : vector<8x32xf32>
    %481 = vector.broadcast %461 : vector<1x32xf32> to vector<8x32xf32>
    %482 = arith.mulf %480, %481 : vector<8x32xf32>
    %483 = vector.broadcast %462 : vector<1x32xf32> to vector<8x32xf32>
    %484 = arith.addf %482, %483 : vector<8x32xf32>
    %c1_298 = arith.constant 1 : index
    %c0_299 = arith.constant 0 : index
    %c0_300 = arith.constant 0 : index
    %485 = vector.load %arg16[%c1_298, %c0_299, %c0_300] : memref<2x8x32xf32, #tpu.memory_space<vmem>>, vector<1x8x32xf32>
    %486 = vector.shape_cast %485 : vector<1x8x32xf32> to vector<8x32xf32>
    %487 = vector.shape_cast %484 : vector<8x32xf32> to vector<1x8x32xf32>
    tpu.vector_store %arg16[%c1_298, %c0_299, %c0_300], %487 {strides = array<i32>} : memref<2x8x32xf32, #tpu.memory_space<vmem>>, vector<1x8x32xf32>,
    return
  }
  func.func @transform_0(%arg0: i32) -> (i32, i32, i32) {
    %c0_i32 = arith.constant 0 : i32
    %c0_i32_0 = arith.constant 0 : i32
    %c0_i32_1 = arith.constant 0 : i32
    return %arg0, %c0_i32, %c0_i32_0 : i32, i32, i32
  }
  func.func @transform_1(%arg0: i32) -> (i32, i32, i32) {
    %c0_i32 = arith.constant 0 : i32
    %c0_i32_0 = arith.constant 0 : i32
    %c0_i32_1 = arith.constant 0 : i32
    %c0_i32_2 = arith.constant 0 : i32
    return %c0_i32, %c0_i32_0, %c0_i32_1 : i32, i32, i32
  }
  func.func @transform_2(%arg0: i32) -> (i32, i32, i32) {
    %c0_i32 = arith.constant 0 : i32
    %c0_i32_0 = arith.constant 0 : i32
    %c0_i32_1 = arith.constant 0 : i32
    %c0_i32_2 = arith.constant 0 : i32
    return %c0_i32, %c0_i32_0, %c0_i32_1 : i32, i32, i32
  }
  func.func @transform_3(%arg0: i32) -> (i32, i32, i32) {
    %c0_i32 = arith.constant 0 : i32
    %c0_i32_0 = arith.constant 0 : i32
    %c0_i32_1 = arith.constant 0 : i32
    %c0_i32_2 = arith.constant 0 : i32
    return %c0_i32, %c0_i32_0, %c0_i32_1 : i32, i32, i32
  }
  func.func @transform_4(%arg0: i32) -> (i32, i32, i32) {
    %c0_i32 = arith.constant 0 : i32
    %c0_i32_0 = arith.constant 0 : i32
    %c0_i32_1 = arith.constant 0 : i32
    %c0_i32_2 = arith.constant 0 : i32
    return %c0_i32, %c0_i32_0, %c0_i32_1 : i32, i32, i32
  }
  func.func @transform_5(%arg0: i32) -> (i32, i32, i32) {
    %c0_i32 = arith.constant 0 : i32
    %c0_i32_0 = arith.constant 0 : i32
    %c0_i32_1 = arith.constant 0 : i32
    %c0_i32_2 = arith.constant 0 : i32
    return %c0_i32, %c0_i32_0, %c0_i32_1 : i32, i32, i32
  }
  func.func @transform_6(%arg0: i32) -> (i32, i32, i32) {
    %c0_i32 = arith.constant 0 : i32
    %c0_i32_0 = arith.constant 0 : i32
    %c0_i32_1 = arith.constant 0 : i32
    %c0_i32_2 = arith.constant 0 : i32
    return %c0_i32, %c0_i32_0, %c0_i32_1 : i32, i32, i32
  }
  func.func @transform_7(%arg0: i32) -> (i32, i32, i32) {
    %c0_i32 = arith.constant 0 : i32
    %c0_i32_0 = arith.constant 0 : i32
    %c0_i32_1 = arith.constant 0 : i32
    %c0_i32_2 = arith.constant 0 : i32
    return %c0_i32, %c0_i32_0, %c0_i32_1 : i32, i32, i32
  }
  func.func @transform_8(%arg0: i32) -> (i32, i32) {
    %c0_i32 = arith.constant 0 : i32
    %c0_i32_0 = arith.constant 0 : i32
    %c0_i32_1 = arith.constant 0 : i32
    return %c0_i32, %c0_i32_0 : i32, i32
  }
  func.func @transform_9(%arg0: i32) -> (i32, i32) {
    %c0_i32 = arith.constant 0 : i32
    %c0_i32_0 = arith.constant 0 : i32
    %c0_i32_1 = arith.constant 0 : i32
    return %c0_i32, %c0_i32_0 : i32, i32
  }
  func.func @transform_10(%arg0: i32) -> (i32, i32) {
    %c0_i32 = arith.constant 0 : i32
    %c0_i32_0 = arith.constant 0 : i32
    %c0_i32_1 = arith.constant 0 : i32
    return %c0_i32, %c0_i32_0 : i32, i32
  }
  func.func @transform_11(%arg0: i32) -> (i32, i32) {
    %c0_i32 = arith.constant 0 : i32
    %c0_i32_0 = arith.constant 0 : i32
    %c0_i32_1 = arith.constant 0 : i32
    return %c0_i32, %c0_i32_0 : i32, i32
  }
  func.func @transform_12(%arg0: i32) -> (i32, i32) {
    %c0_i32 = arith.constant 0 : i32
    %c0_i32_0 = arith.constant 0 : i32
    %c0_i32_1 = arith.constant 0 : i32
    return %c0_i32, %c0_i32_0 : i32, i32
  }
  func.func @transform_13(%arg0: i32) -> (i32, i32) {
    %c0_i32 = arith.constant 0 : i32
    %c0_i32_0 = arith.constant 0 : i32
    %c0_i32_1 = arith.constant 0 : i32
    return %c0_i32, %c0_i32_0 : i32, i32
  }
  func.func @transform_14(%arg0: i32) -> (i32, i32) {
    %c0_i32 = arith.constant 0 : i32
    %c0_i32_0 = arith.constant 0 : i32
    %c0_i32_1 = arith.constant 0 : i32
    return %c0_i32, %c0_i32_0 : i32, i32
  }
  func.func @transform_15(%arg0: i32) -> (i32, i32, i32) {
    %c0_i32 = arith.constant 0 : i32
    %c0_i32_0 = arith.constant 0 : i32
    %c0_i32_1 = arith.constant 0 : i32
    return %arg0, %c0_i32, %c0_i32_0 : i32, i32, i32
  }
}

</mosaic_0001>

<bundles_post_ra>
// kernel: tpu_custom_call.1
= control target key start
LH: loop header
LB: loop body
LE: loop exit
PB: predicated region body
PF: predicated region fallthrough
CT: control target
= control target key end

     0   :  { %v3977_v1 = vmov 0.0   ;;  %vm3978_vm0 = vmmov 0   ;;  %vm77_vm1 = vcmask 261120   ;;  %s4716_s0 = inlined_call_operand.vmem [shape: f32[2,8,32], index: 0, kind: input, shape index: {}]   ;;  %s4717_s1 = inlined_call_operand.vmem [shape: bf16[4,32,8], index: 1, kind: input, shape index: {}]   ;;  %s4718_s2 = inlined_call_operand.vmem [shape: f32[4,1,8], index: 2, kind: input, shape index: {}]   ;;  %s4719_s3 = inlined_call_operand.vmem [shape: bf16[4,32,8], index: 3, kind: input, shape index: {}]   ;;  %s4720_s4 = inlined_call_operand.vmem [shape: f32[4,1,8], index: 4, kind: input, shape index: {}]   ;;  %s4721_s5 = inlined_call_operand.vmem [shape: bf16[4,32,8], index: 5, kind: input, shape index: {}]   ;;  %s4722_s6 = inlined_call_operand.vmem [shape: f32[4,1,8], index: 6, kind: input, shape index: {}]   ;;  %s4723_s7 = inlined_call_operand.vmem [shape: bf16[4,8,32], index: 7, kind: input, shape index: {}]   ;;  %s4724_s8 = inlined_call_operand.vmem [shape: f32[1,32], index: 8, kind: input, shape index: {}]   ;;  %s4725_s9 = inlined_call_operand.vmem [shape: f32[1,32], index: 9, kind: input, shape index: {}]   ;;  %s4726_s10 = inlined_call_operand.vmem [shape: f32[1,32], index: 10, kind: input, shape index: {}]   ;;  %s4727_s11 = inlined_call_operand.vmem [shape: bf16[32,32], index: 11, kind: input, shape index: {}]   ;;  %s4728_s12 = inlined_call_operand.vmem [shape: f32[1,32], index: 12, kind: input, shape index: {}]   ;;  %s4729_s13 = inlined_call_operand.vmem [shape: f32[1,32], index: 13, kind: input, shape index: {}]   ;;  %s4730_s14 = inlined_call_operand.vmem [shape: f32[1,32], index: 14, kind: input, shape index: {}]   ;;  %s4731_s15 = inlined_call_operand.hbm [shape: f32[2,8,32], index: 15, kind: output, shape index: {}]  }
   0x1   :  { %v3861_v0 = vld [vmem:[%s4719_s3] sm:$0xff]   ;;  %3512 = vmatprep.subr.bf16.mxu1 %v3977_v1  ;;  %3504 = vmatprep.subr.bf16.mxu0 %v3977_v1  ;;  %v3863_v3 = vld [vmem:[%s4719_s3 + $0x8] sm:$0xff]  }
   0x2   :  { %v3862_v2 = vld [vmem:[%s4717_s1] sm:$0xff]   ;;  %3513 = vmatpush3.bf16.msra.mxu1 %v3861_v0  ;;  %3516 = vmatprep.mubr.msk.bf16.mxu1 %vm3978_vm0, %v3977_v1  ;;  %v3864_v4 = vld [vmem:[%s4717_s1 + $0x8] sm:$0xff]  }
   0x3   :  { %3505 = vmatpush3.bf16.msra.mxu0 %v3862_v2  ;;  %3514 = vmatprep.subr.bf16.mxu1 %v3977_v1  ;;  %v4083_v5 = vld [vmem:[%s4716_s0] sm:$0xff] }
   0x4   :  { %3506 = vmatprep.subr.bf16.mxu0 %v3977_v1  ;;  %3508 = vmatprep.mubr.msk.bf16.mxu0 %vm3978_vm0, %v3977_v1  ;;  %v4089_v6 = vpack.c.bf16 %v4083_v5, %v4083_v5 }
   0x6   :  { %3515 = vmatpush3.bf16.msra.mxu1 %v3863_v3 }
   0x7   :  { %3507 = vmatpush3.bf16.msra.mxu0 %v3864_v4  ;;  %3528 = vmatprep.subr.bf16.mxu1 %v3977_v1 }
   0x8   :  { %3520 = vmatprep.subr.bf16.mxu0 %v3977_v1 }
   0x9   :  { %3517 = vmatmul.mubr.msk.bf16.vlgmr.msra.gmra.mrb[0].mxu1 %vm77_vm1, %v4089_v6 }
   0xa   :  { %3509 = vmatmul.mubr.msk.bf16.vlgmr.msra.gmra.mrb[0].mxu0 %vm77_vm1, %v4089_v6  ;;  %3530 = vmatprep.mubr.msk.bf16.mxu1 %vm3978_vm0, %v3977_v1 }
   0xb   :  { %3524 = vmatprep.mubr.msk.bf16.mxu0 %vm3978_vm0, %v3977_v1 }
   0xc   :  { %20 = vsyncpa [#allocation3], 0  ;;  %v4104_v7 = vld [vmem:[%s4720_s4] ss:$0 sm:$0xff]  ;;  %vm250_vm2 = vcmask 64512   ;;  %v3866_v24 = vld [vmem:[%s4721_s5 + $0x8] sm:$0xff]  }
   0xd   :  { %v4109_v8 = vld [vmem:[%s4718_s2] ss:$0 sm:$0xff]  ;;  %vm313_vm3 = vcmask 1043456   ;;  %v3868_v43 = vld [vmem:[%s4717_s1 + $0x10] sm:$0xff]   ;;  %v3870_v44 = vld [vmem:[%s4717_s1 + $0x18] sm:$0xff]  }
   0xe   :  { %v3865_v23 = vld [vmem:[%s4721_s5] sm:$0xff]   ;;  %v3867_v48 = vld [vmem:[%s4719_s3 + $0x10] sm:$0xff]   ;;  %v3869_v50 = vld [vmem:[%s4719_s3 + $0x18] sm:$0xff]  }
   0xf   :  { %3521 = vmatpush3.bf16.msra.mxu0 %v3865_v23  ;;  %v4135_v38 = vld [vmem:[%s4722_s6] ss:$0 sm:$0xff]  ;;  %v4172_v59 = vld [vmem:[%s4720_s4 + $0x1] ss:$0 sm:$0xff] }
  0x10   :  { %3522 = vmatprep.subr.bf16.mxu0 %v3977_v1  ;;  %v4177_v60 = vld [vmem:[%s4718_s2 + $0x1] ss:$0 sm:$0xff] }
  0x13   :  { %3523 = vmatpush3.bf16.msra.mxu0 %v3866_v24 }
  0x14   :  { %3534 = vmatprep.subr.bf16.mxu0 %v3977_v1 }
  0x16   :  { %3525 = vmatmul.mubr.msk.bf16.vlgmr.msra.gmra.mrb[4].mxu0 %vm77_vm1, %v4089_v6 }
  0x17   :  { %3536 = vmatprep.mubr.msk.bf16.mxu0 %vm3978_vm0, %v3977_v1 }
  0xdc   :  { %v178_v9 = vpop.f32.mrb[0].mxu1 }
  0xdd   :  { %v179_v10 = vadd.f32 %v4104_v7, %v178_v9  ;;  %v3518_v11 = vpop.f32.mrb[1].mxu1  ;;  %v115_v12 = vpop.f32.mrb[0].mxu0 }
  0xde   :  { %v181_v13 = vpop.f32.mrb[2].mxu1  ;;  %v116_v14 = vadd.f32 %v4109_v8, %v115_v12  ;;  %v3510_v15 = vpop.f32.mrb[1].mxu0  ;;  %v3871_v12 = vld [vmem:[%s4721_s5 + $0x10] sm:$0xff]  }
  0xdf   :  { %v249_v16 = vpack.c.bf16 %v179_v10, %v179_v10  ;;  %v3519_v17 = vpop.f32.mrb[3].mxu1  ;;  %v118_v18 = vpop.f32.mrb[2].mxu0  ;;  %v3872_v13 = vld [vmem:[%s4721_s5 + $0x18] sm:$0xff]  }
  0xe0   :  { %v3511_v19 = vpop.f32.mrb[3].mxu0  ;;  %v247_v21 = vmul.f32 0.35355338, %v116_v14 }
  0xe1   :  { %v255_v20 = vsel %vm250_vm2, %v249_v16, 0  ;;  %v4202_v19 = vld [vmem:[%s4722_s6 + $0x1] ss:$0 sm:$0xff] }
  0xe2   :  { %3529 = vmatpush3.bf16.xpose.msra.mxu1 %v255_v20  ;;  %v248_v22 = vpack.c.bf16 %v247_v21, %v247_v21 }
  0xe3   :  { %3540 = vmatprep.subr.bf16.mxu1 %v3977_v1 }
  0xe9   :  { %3531 = vmatmul.mubr.msk.bf16.vlgmr.msra.gmra.mrb[4].mxu1 %vm250_vm2, %v248_v22  ;;  %v241_v35 = vpop.f32.mrb[4].mxu0 }
  0xea   :  { %3544 = vmatprep.mubr.msk.bf16.mxu1 %vm3978_vm0, %v3977_v1  ;;  %v3526_v36 = vpop.f32.mrb[5].mxu0  ;;  %v242_v40 = vadd.f32 %v4135_v38, %v241_v35  ;;  %3541 = vmatpush3.bf16.msra.mxu1 %v3868_v43  ;;  %v3874_v43 = vld [vmem:[%s4719_s3 + $0x28] sm:$0xff]  }
  0xeb   :  { %v244_v37 = vpop.f32.mrb[6].mxu0  ;;  %3542 = vmatprep.subr.bf16.mxu1 %v3977_v1  ;;  %v358_v36 = vld [vmem:[%s4723_s7] sm:$0xf] }
  0xec   :  { %v3527_v39 = vpop.f32.mrb[7].mxu0  ;;  %v309_v41 = vpack.c.bf16 %v242_v40, %v242_v40  ;;  %v715_v40 = vsel %vm313_vm3, %v358_v36, 0 }
  0xee   :  { %v315_v42 = vsel %vm313_vm3, %v309_v41, 0  ;;  %3543 = vmatpush3.bf16.msra.mxu1 %v3870_v44  ;;  %v3873_v41 = vld [vmem:[%s4719_s3 + $0x20] sm:$0xff]  }
  0xef   :  { %3535 = vmatpush3.bf16.msra.mxu0 %v315_v42  ;;  %3556 = vmatprep.subr.bf16.mxu1 %v3977_v1 }
  0xf0   :  { %3548 = vmatprep.subr.bf16.mxu0 %v3977_v1 }
  0xf1   :  { %3545 = vmatmul.mubr.msk.bf16.vlgmr.msra.gmra.mrb[8].mxu1 %vm77_vm1, %v4089_v6 }
  0xf2   :  { %3560 = vmatprep.mubr.msk.bf16.mxu1 %vm3978_vm0, %v3977_v1  ;;  %3557 = vmatpush3.bf16.msra.mxu1 %v3871_v12 }
  0xf3   :  { %3558 = vmatprep.subr.bf16.mxu1 %v3977_v1 }
  0xf6   :  { %3559 = vmatpush3.bf16.msra.mxu1 %v3872_v13 }
  0xf7   :  { %3570 = vmatprep.subr.bf16.mxu1 %v3977_v1 }
  0xf9   :  { %3561 = vmatmul.mubr.msk.bf16.vlgmr.msra.gmra.mrb[12].mxu1 %vm77_vm1, %v4089_v6 }
  0xfa   :  { %3572 = vmatprep.mubr.msk.bf16.mxu1 %vm3978_vm0, %v3977_v1 }
 0x1bc   :  { %v291_v25 = vpop.f32.mrb[4].mxu1 }
 0x1bd   :  { %v3532_v26 = vpop.f32.mrb[5].mxu1  ;;  %v297_v27 = vsel %vm250_vm2, %v291_v25, -inf }
 0x1be   :  { %298 = vmax.xlane.f32.xlu0 %v297_v27  ;;  %v294_v28 = vpop.f32.mrb[6].mxu1 }
 0x1bf   :  { %v3533_v29 = vpop.f32.mrb[7].mxu1 }
 0x1c4   :  { %v418_v51 = vpop.f32.mrb[8].mxu1 }
 0x1c5   :  { %v3546_v52 = vpop.f32.mrb[9].mxu1  ;;  %v419_v0 = vadd.f32 %v4177_v60, %v418_v51 }
 0x1c6   :  { %v421_v53 = vpop.f32.mrb[10].mxu1 }
 0x1c7   :  { %v3547_v54 = vpop.f32.mrb[11].mxu1  ;;  %v554_v10 = vmul.f32 0.35355338, %v419_v0 }
 0x1c9   :  { %v555_v11 = vpack.c.bf16 %v554_v10, %v554_v10 }
 0x1cc   :  { %v548_v20 = vpop.f32.mrb[12].mxu1 }
 0x1cd   :  { %v549_v21 = vadd.f32 %v4202_v19, %v548_v20  ;;  %v3562_v22 = vpop.f32.mrb[13].mxu1  ;;  %v3877_v20 = vld [vmem:[%s4721_s5 + $0x20] sm:$0xff]  }
 0x1ce   :  { %v551_v23 = vpop.f32.mrb[14].mxu1 }
 0x1cf   :  { %v615_v24 = vpack.c.bf16 %v549_v21, %v549_v21  ;;  %v3878_v21 = vld [vmem:[%s4721_s5 + $0x28] sm:$0xff]  }
 0x1d1   :  { %v620_v26 = vsel %vm313_vm3, %v615_v24, 0 }
 0x1d2   :  { %3571 = vmatpush3.bf16.msra.mxu1 %v620_v26 }
 0x1d3   :  { %3582 = vmatprep.subr.bf16.mxu1 %v3977_v1 }
 0x24b   :  { %v299_v30 = vpop.xlane.xlu0 %298 }
 0x24c   :  { %v300_v31 = vsub.f32 %v291_v25, %v299_v30  ;;  %v3563_v25 = vpop.f32.mrb[15].mxu1 }
 0x24e   :  { %v301_v32 = vmul.f32 1.442695, %v300_v31 }
 0x250   :  { %3913 = vpow2.f32 %v301_v32  ;;  %v3186_v32 = vld [vmem:[%s4723_s7 + $0x4] sm:$0xf] }
 0x25a   :  { %v3914_v33 = vpop.eup %3913 }
 0x25b   :  { %v303_v34 = vsel %vm250_vm2, %v3914_v33, 0.0 }
 0x25c   :  { %304 = vadd.xlane.f32.xlu0 %v303_v34 }
 0x2e9   :  { %v305_v45 = vpop.xlane.xlu0 %304 }
 0x2ea   :  { %3915 = vrcp.f32 %v305_v45  ;;  %v3875_v45 = vld [vmem:[%s4717_s1 + $0x20] sm:$0xff]  }
 0x2f4   :  { %v3916_v46 = vpop.eup %3915 }
 0x2f5   :  { %v307_v47 = vmul.f32 %v3916_v46, %v3914_v33  ;;  %v669_v33 = vsel %vm313_vm3, %v3186_v32, 0 }
 0x2f7   :  { %v308_v49 = vpack.c.bf16 %v307_v47, %v307_v47 }
 0x2f9   :  { %3537 = vmatmul.mubr.msk.bf16.vlgmr.msra.gmra.mrb[8].mxu0 %vm250_vm2, %v308_v49 }
 0x2fa   :  { %3549 = vmatpush3.bf16.msra.mxu0 %v3867_v48  ;;  %3552 = vmatprep.mubr.msk.bf16.mxu0 %vm3978_vm0, %v3977_v1 }
 0x2fb   :  { %3550 = vmatprep.subr.bf16.mxu0 %v3977_v1 }
 0x2fe   :  { %3551 = vmatpush3.bf16.msra.mxu0 %v3869_v50  ;;  %v3876_v50 = vld [vmem:[%s4717_s1 + $0x28] sm:$0xff]  }
 0x2ff   :  { %3564 = vmatprep.subr.bf16.mxu0 %v3977_v1 }
 0x301   :  { %3553 = vmatmul.mubr.msk.bf16.vlgmr.msra.gmra.mrb[12].mxu0 %vm77_vm1, %v4089_v6 }
 0x302   :  { %3566 = vmatprep.mubr.msk.bf16.mxu0 %vm3978_vm0, %v3977_v1 }
 0x3cc   :  { %v4167_v55 = vpop.f32.mrb[8].mxu0 }
 0x3cd   :  { %v3538_v56 = vpop.f32.mrb[9].mxu0  ;;  %v357_v42 = vpack.c.bf16 %v4167_v55, %v4167_v55  ;;  %v4256_v55 = vld [vmem:[%s4720_s4 + $0x2] ss:$0 sm:$0xff] }
 0x3ce   :  { %v354_v57 = vpop.f32.mrb[10].mxu0 }
 0x3cf   :  { %v3539_v58 = vpop.f32.mrb[11].mxu0 }
 0x3d4   :  { %v483_v61 = vpop.f32.mrb[12].mxu0 }
 0x3d5   :  { %v484_v62 = vadd.f32 %v4172_v59, %v483_v61  ;;  %v3554_v63 = vpop.f32.mrb[13].mxu0 }
 0x3d6   :  { %v486_v2 = vpop.f32.mrb[14].mxu0 }
 0x3d7   :  { %v556_v3 = vpack.c.bf16 %v484_v62, %v484_v62  ;;  %v3555_v4 = vpop.f32.mrb[15].mxu0 }
 0x3d9   :  { %v561_v9 = vsel %vm250_vm2, %v556_v3, 0 }
 0x3da   :  { %3565 = vmatpush3.bf16.xpose.msra.mxu0 %v561_v9 }
 0x3db   :  { %3576 = vmatprep.subr.bf16.mxu0 %v3977_v1 }
 0x3e1   :  { %3567 = vmatmul.mubr.msk.bf16.vlgmr.msra.gmra.mrb[16].mxu0 %vm250_vm2, %v555_v11  ;;  %v4266_v11 = vld [vmem:[%s4718_s2 + $0x2] ss:$0 sm:$0xff] }
 0x3e2   :  { %3578 = vmatprep.mubr.msk.bf16.mxu0 %vm3978_vm0, %v3977_v1  ;;  %3577 = vmatpush3.bf16.msra.mxu0 %v669_v33 }
 0x3e3   :  { %3588 = vmatprep.subr.bf16.mxu0 %v3977_v1 }
 0x4b4   :  { %v597_v14 = vpop.f32.mrb[16].mxu0 }
 0x4b5   :  { %v3568_v15 = vpop.f32.mrb[17].mxu0  ;;  %v603_v16 = vsel %vm250_vm2, %v597_v14, -inf }
 0x4b6   :  { %604 = vmax.xlane.f32.xlu1 %v603_v16  ;;  %v600_v17 = vpop.f32.mrb[18].mxu0 }
 0x4b7   :  { %v3569_v18 = vpop.f32.mrb[19].mxu0 }
 0x543   :  { %v605_v27 = vpop.xlane.xlu1 %604 }
 0x544   :  { %v606_v28 = vsub.f32 %v597_v14, %v605_v27 }
 0x546   :  { %v607_v29 = vmul.f32 1.442695, %v606_v28 }
 0x548   :  { %3917 = vpow2.f32 %v607_v29 }
 0x552   :  { %v3918_v30 = vpop.eup %3917 }
 0x553   :  { %v609_v31 = vsel %vm250_vm2, %v3918_v30, 0.0 }
 0x554   :  { %610 = vadd.xlane.f32.xlu1 %v609_v31 }
 0x5e1   :  { %v611_v34 = vpop.xlane.xlu1 %610 }
 0x5e2   :  { %3919 = vrcp.f32 %v611_v34 }
 0x5ec   :  { %v3920_v35 = vpop.eup %3919 }
 0x5ed   :  { %v613_v37 = vmul.f32 %v3920_v35, %v3918_v30  ;;  %v4289_v35 = vld [vmem:[%s4722_s6 + $0x2] ss:$0 sm:$0xff] }
 0x5ef   :  { %v614_v39 = vpack.c.bf16 %v613_v37, %v613_v37 }
 0x5f1   :  { %3573 = vmatmul.mubr.msk.bf16.vlgmr.msra.gmra.mrb[16].mxu1 %vm250_vm2, %v614_v39 }
 0x5f2   :  { %3583 = vmatpush3.bf16.msra.mxu1 %v715_v40  ;;  %3584 = vmatprep.mubr.msk.bf16.mxu1 %vm3978_vm0, %v3977_v1 }
 0x5f3   :  { %3596 = vmatprep.subr.bf16.mxu1 %v3977_v1 }
 0x5f9   :  { %3585 = vmatmul.mubr.msk.bf16.vlgmr.msra.gmra.mrb[20].mxu1 %vm250_vm2, %v357_v42 }
 0x5fa   :  { %3597 = vmatpush3.bf16.msra.mxu1 %v3873_v41  ;;  %3600 = vmatprep.mubr.msk.bf16.mxu1 %vm3978_vm0, %v3977_v1  ;;  %v3218_v41 = vld [vmem:[%s4723_s7 + $0x8] sm:$0xf] }
 0x5fb   :  { %3598 = vmatprep.subr.bf16.mxu1 %v3977_v1  ;;  %v1067_v42 = vsel %vm313_vm3, %v3218_v41, 0 }
 0x5fe   :  { %3599 = vmatpush3.bf16.msra.mxu1 %v3874_v43 }
 0x5ff   :  { %3612 = vmatprep.subr.bf16.mxu1 %v3977_v1 }
 0x601   :  { %3601 = vmatmul.mubr.msk.bf16.vlgmr.msra.gmra.mrb[24].mxu1 %vm77_vm1, %v4089_v6 }
 0x602   :  { %3614 = vmatprep.mubr.msk.bf16.mxu1 %vm3978_vm0, %v3977_v1 }
 0x6c4   :  { %v656_v44 = vpop.f32.mrb[16].mxu1 }
 0x6c5   :  { %v662_v46 = vpack.c.bf16 %v656_v44, %v656_v44  ;;  %v3574_v47 = vpop.f32.mrb[17].mxu1 }
 0x6c6   :  { %v659_v48 = vpop.f32.mrb[18].mxu1  ;;  %v3880_v47 = vld [vmem:[%s4717_s1 + $0x30] sm:$0xff]  }
 0x6c7   :  { %v3575_v49 = vpop.f32.mrb[19].mxu1  ;;  %3579 = vmatmul.mubr.msk.bf16.vlgmr.msra.gmra.mrb[20].mxu0 %vm250_vm2, %v662_v46  ;;  %v3882_v48 = vld [vmem:[%s4717_s1 + $0x38] sm:$0xff]  }
 0x6c8   :  { %3589 = vmatpush3.bf16.msra.mxu0 %v3875_v45  ;;  %3592 = vmatprep.mubr.msk.bf16.mxu0 %vm3978_vm0, %v3977_v1 }
 0x6c9   :  { %3590 = vmatprep.subr.bf16.mxu0 %v3977_v1 }
 0x6cc   :  { %v751_v51 = vpop.f32.mrb[20].mxu1  ;;  %3591 = vmatpush3.bf16.msra.mxu0 %v3876_v50  ;;  %v3879_v50 = vld [vmem:[%s4719_s3 + $0x30] sm:$0xff]  }
 0x6cd   :  { %v3586_v52 = vpop.f32.mrb[21].mxu1  ;;  %3604 = vmatprep.subr.bf16.mxu0 %v3977_v1 }
 0x6ce   :  { %v754_v53 = vpop.f32.mrb[22].mxu1 }
 0x6cf   :  { %v3587_v54 = vpop.f32.mrb[23].mxu1  ;;  %3593 = vmatmul.mubr.msk.bf16.vlgmr.msra.gmra.mrb[24].mxu0 %vm77_vm1, %v4089_v6 }
 0x6d0   :  { %3608 = vmatprep.mubr.msk.bf16.mxu0 %vm3978_vm0, %v3977_v1  ;;  %3605 = vmatpush3.bf16.msra.mxu0 %v3877_v20 }
 0x6d1   :  { %3606 = vmatprep.subr.bf16.mxu0 %v3977_v1 }
 0x6d4   :  { %v881_v56 = vpop.f32.mrb[24].mxu1  ;;  %3607 = vmatpush3.bf16.msra.mxu0 %v3878_v21 }
 0x6d5   :  { %v882_v57 = vadd.f32 %v4256_v55, %v881_v56  ;;  %v3602_v58 = vpop.f32.mrb[25].mxu1  ;;  %3618 = vmatprep.subr.bf16.mxu0 %v3977_v1  ;;  %v3881_v56 = vld [vmem:[%s4719_s3 + $0x38] sm:$0xff]  }
 0x6d6   :  { %v884_v61 = vpop.f32.mrb[26].mxu1 }
 0x6d7   :  { %v954_v62 = vpack.c.bf16 %v882_v57, %v882_v57  ;;  %v3603_v63 = vpop.f32.mrb[27].mxu1  ;;  %3609 = vmatmul.mubr.msk.bf16.vlgmr.msra.gmra.mrb[28].mxu0 %vm77_vm1, %v4089_v6 }
 0x6d8   :  { %3620 = vmatprep.mubr.msk.bf16.mxu0 %vm3978_vm0, %v3977_v1 }
 0x6d9   :  { %v959_v0 = vsel %vm250_vm2, %v954_v62, 0 }
 0x6da   :  { %3613 = vmatpush3.bf16.xpose.msra.mxu1 %v959_v0 }
 0x6db   :  { %3624 = vmatprep.subr.bf16.mxu1 %v3977_v1 }
 0x79a   :  { %v705_v2 = vpop.f32.mrb[20].mxu0 }
 0x79b   :  { %v4261_v3 = vadd.f32 %v751_v51, %v705_v2  ;;  %v3580_v4 = vpop.f32.mrb[21].mxu0 }
 0x79c   :  { %v708_v9 = vpop.f32.mrb[22].mxu0 }
 0x79d   :  { %v3581_v10 = vpop.f32.mrb[23].mxu0 }
 0x79e   :  { %v4335_v10 = vld [vmem:[%s4720_s4 + $0x3] ss:$0 sm:$0xff] }
 0x7a2   :  { %v816_v12 = vpop.f32.mrb[24].mxu0 }
 0x7a3   :  { %v817_v13 = vadd.f32 %v4266_v11, %v816_v12  ;;  %v3594_v14 = vpop.f32.mrb[25].mxu0  ;;  %v4340_v12 = vld [vmem:[%s4718_s2 + $0x3] ss:$0 sm:$0xff] }
 0x7a4   :  { %v819_v15 = vpop.f32.mrb[26].mxu0 }
 0x7a5   :  { %v952_v16 = vmul.f32 0.35355338, %v817_v13  ;;  %v3595_v17 = vpop.f32.mrb[27].mxu0 }
 0x7a7   :  { %v953_v18 = vpack.c.bf16 %v952_v16, %v952_v16 }
 0x7a9   :  { %3615 = vmatmul.mubr.msk.bf16.vlgmr.msra.gmra.mrb[28].mxu1 %vm250_vm2, %v953_v18 }
 0x7aa   :  { %3626 = vmatprep.mubr.msk.bf16.mxu1 %vm3978_vm0, %v3977_v1  ;;  %v946_v32 = vpop.f32.mrb[28].mxu0  ;;  %3625 = vmatpush3.bf16.msra.mxu1 %v1067_v42 }
 0x7ab   :  { %v3610_v33 = vpop.f32.mrb[29].mxu0  ;;  %v947_v37 = vadd.f32 %v4289_v35, %v946_v32  ;;  %3638 = vmatprep.subr.bf16.mxu1 %v3977_v1 }
 0x7ac   :  { %v949_v34 = vpop.f32.mrb[30].mxu0 }
 0x7ad   :  { %v3611_v36 = vpop.f32.mrb[31].mxu0  ;;  %v1013_v39 = vpack.c.bf16 %v947_v37, %v947_v37 }
 0x7af   :  { %v1018_v40 = vsel %vm313_vm3, %v1013_v39, 0  ;;  %v4366_v39 = vld [vmem:[%s4722_s6 + $0x3] ss:$0 sm:$0xff] }
 0x7b0   :  { %3619 = vmatpush3.bf16.msra.mxu0 %v1018_v40 }
 0x7b1   :  { %3630 = vmatprep.subr.bf16.mxu0 %v3977_v1 }
 0x87c   :  { %v995_v22 = vpop.f32.mrb[28].mxu1 }
 0x87d   :  { %v3616_v23 = vpop.f32.mrb[29].mxu1  ;;  %v1001_v24 = vsel %vm250_vm2, %v995_v22, -inf }
 0x87e   :  { %1002 = vmax.xlane.f32.xlu0 %v1001_v24  ;;  %v998_v25 = vpop.f32.mrb[30].mxu1  ;;  %v3883_v23 = vld [vmem:[%s4721_s5 + $0x30] sm:$0xff]   ;;  %v3884_v24 = vld [vmem:[%s4721_s5 + $0x38] sm:$0xff]  }
 0x87f   :  { %v3617_v26 = vpop.f32.mrb[31].mxu1 }
 0x90b   :  { %v1003_v27 = vpop.xlane.xlu0 %1002 }
 0x90c   :  { %v1004_v28 = vsub.f32 %v995_v22, %v1003_v27 }
 0x90e   :  { %v1005_v29 = vmul.f32 1.442695, %v1004_v28 }
 0x910   :  { %3921 = vpow2.f32 %v1005_v29 }
 0x91a   :  { %v3922_v30 = vpop.eup %3921 }
 0x91b   :  { %v1007_v31 = vsel %vm250_vm2, %v3922_v30, 0.0 }
 0x91c   :  { %1008 = vadd.xlane.f32.xlu1 %v1007_v31 }
 0x9a9   :  { %v1009_v43 = vpop.xlane.xlu1 %1008 }
 0x9aa   :  { %3923 = vrcp.f32 %v1009_v43 }
 0x9b4   :  { %v3924_v44 = vpop.eup %3923 }
 0x9b5   :  { %v1011_v45 = vmul.f32 %v3924_v44, %v3922_v30  ;;  %v3249_v44 = vld [vmem:[%s4723_s7 + $0xc] sm:$0xf] }
 0x9b7   :  { %v1012_v46 = vpack.c.bf16 %v1011_v45, %v1011_v45  ;;  %v1420_v45 = vsel %vm313_vm3, %v3249_v44, 0 }
 0x9b9   :  { %3621 = vmatmul.mubr.msk.bf16.vlgmr.msra.gmra.mrb[32].mxu0 %vm250_vm2, %v1012_v46 }
 0x9ba   :  { %3634 = vmatprep.mubr.msk.bf16.mxu0 %vm3978_vm0, %v3977_v1  ;;  %3631 = vmatpush3.bf16.msra.mxu0 %v3880_v47 }
 0x9bb   :  { %3632 = vmatprep.subr.bf16.mxu0 %v3977_v1 }
 0x9be   :  { %3633 = vmatpush3.bf16.msra.mxu0 %v3882_v48 }
 0x9bf   :  { %3646 = vmatprep.subr.bf16.mxu0 %v3977_v1 }
 0x9c1   :  { %3635 = vmatmul.mubr.msk.bf16.vlgmr.msra.gmra.mrb[36].mxu0 %vm77_vm1, %v4089_v6 }
 0x9c2   :  { %3650 = vmatprep.mubr.msk.bf16.mxu0 %vm3978_vm0, %v3977_v1  ;;  %3647 = vmatpush3.bf16.msra.mxu0 %v3883_v23 }
 0x9c3   :  { %3648 = vmatprep.subr.bf16.mxu0 %v3977_v1 }
 0x9c6   :  { %3649 = vmatpush3.bf16.msra.mxu0 %v3884_v24 }
 0x9c7   :  { %3660 = vmatprep.subr.bf16.mxu0 %v3977_v1 }
 0x9c9   :  { %3651 = vmatmul.mubr.msk.bf16.vlgmr.msra.gmra.mrb[40].mxu0 %vm77_vm1, %v4089_v6 }
 0x9ca   :  { %3662 = vmatprep.mubr.msk.bf16.mxu0 %vm3978_vm0, %v3977_v1 }
 0xa8c   :  { %v1054_v49 = vpop.f32.mrb[32].mxu0 }
 0xa8d   :  { %v1060_v51 = vpack.c.bf16 %v1054_v49, %v1054_v49  ;;  %v3622_v52 = vpop.f32.mrb[33].mxu0 }
 0xa8e   :  { %v1057_v53 = vpop.f32.mrb[34].mxu0 }
 0xa8f   :  { %v3623_v54 = vpop.f32.mrb[35].mxu0  ;;  %3627 = vmatmul.mubr.msk.bf16.vlgmr.msra.gmra.mrb[32].mxu1 %vm250_vm2, %v1060_v51 }
 0xa90   :  { %3639 = vmatpush3.bf16.msra.mxu1 %v3879_v50  ;;  %3642 = vmatprep.mubr.msk.bf16.mxu1 %vm3978_vm0, %v3977_v1 }
 0xa91   :  { %3640 = vmatprep.subr.bf16.mxu1 %v3977_v1 }
 0xa94   :  { %3641 = vmatpush3.bf16.msra.mxu1 %v3881_v56  ;;  %v1169_v57 = vpop.f32.mrb[36].mxu0 }
 0xa95   :  { %3654 = vmatprep.subr.bf16.mxu1 %v3977_v1  ;;  %v3636_v58 = vpop.f32.mrb[37].mxu0 }
 0xa96   :  { %v1172_v61 = vpop.f32.mrb[38].mxu0 }
 0xa97   :  { %3643 = vmatmul.mubr.msk.bf16.vlgmr.msra.gmra.mrb[36].mxu1 %vm77_vm1, %v4089_v6  ;;  %v3637_v62 = vpop.f32.mrb[39].mxu0 }
 0xa98   :  { %3656 = vmatprep.mubr.msk.bf16.mxu1 %vm3978_vm0, %v3977_v1 }
 0xa9c   :  { %v1299_v36 = vpop.f32.mrb[40].mxu0 }
 0xa9d   :  { %v3652_v6 = vpop.f32.mrb[41].mxu0  ;;  %v1300_v41 = vadd.f32 %v4366_v39, %v1299_v36 }
 0xa9e   :  { %v1302_v37 = vpop.f32.mrb[42].mxu0 }
 0xa9f   :  { %v3653_v40 = vpop.f32.mrb[43].mxu0  ;;  %v1366_v42 = vpack.c.bf16 %v1300_v41, %v1300_v41 }
 0xaa1   :  { %v1371_v43 = vsel %vm313_vm3, %v1366_v42, 0 }
 0xaa2   :  { %3661 = vmatpush3.bf16.msra.mxu0 %v1371_v43 }
 0xaa3   :  { %3672 = vmatprep.subr.bf16.mxu0 %v3977_v1 }
 0xb62   :  { %v1103_v63 = vpop.f32.mrb[32].mxu1 }
 0xb63   :  { %v4330_v0 = vadd.f32 %v1103_v63, %v4261_v3  ;;  %v3628_v2 = vpop.f32.mrb[33].mxu1  ;;  %v1170_v3 = vadd.f32 %v4340_v12, %v1169_v57  ;;  %v4385_v57 = vld [vmem:[%s4724_s8] ss:$0 sm:$0xff] }
 0xb64   :  { %v1106_v4 = vpop.f32.mrb[34].mxu1 }
 0xb65   :  { %v3629_v9 = vpop.f32.mrb[35].mxu1  ;;  %v1305_v21 = vmul.f32 0.35355338, %v1170_v3 }
 0xb67   :  { %v1306_v22 = vpack.c.bf16 %v1305_v21, %v1305_v21 }
 0xb6a   :  { %v1234_v13 = vpop.f32.mrb[36].mxu1 }
 0xb6b   :  { %v1235_v14 = vadd.f32 %v4335_v10, %v1234_v13  ;;  %v3644_v15 = vpop.f32.mrb[37].mxu1 }
 0xb6c   :  { %v1237_v16 = vpop.f32.mrb[38].mxu1 }
 0xb6d   :  { %v1307_v17 = vpack.c.bf16 %v1235_v14, %v1235_v14  ;;  %v3645_v18 = vpop.f32.mrb[39].mxu1 }
 0xb6e   :  { %v3890_v18 = vld [vmem:[%s4717_s1 + $0x8] sm:$0xff]  }
 0xb6f   :  { %v1312_v20 = vsel %vm250_vm2, %v1307_v17, 0  ;;  %v3888_v17 = vld [vmem:[%s4717_s1] sm:$0xff]  }
 0xb70   :  { %3655 = vmatpush3.bf16.xpose.msra.mxu1 %v1312_v20  ;;  %v4410_v20 = vld [vmem:[%s4716_s0 + $0x8] sm:$0xff] }
 0xb71   :  { %3666 = vmatprep.subr.bf16.mxu1 %v3977_v1  ;;  %v4414_v21 = vpack.c.bf16 %v4410_v20, %v4410_v20 }
 0xb77   :  { %3657 = vmatmul.mubr.msk.bf16.vlgmr.msra.gmra.mrb[40].mxu1 %vm250_vm2, %v1306_v22 }
 0xb78   :  { %3668 = vmatprep.mubr.msk.bf16.mxu1 %vm3978_vm0, %v3977_v1  ;;  %3667 = vmatpush3.bf16.msra.mxu1 %v1420_v45 }
 0xb79   :  { %3680 = vmatprep.subr.bf16.mxu1 %v3977_v1 }
 0xc4a   :  { %v1348_v25 = vpop.f32.mrb[40].mxu1 }
 0xc4b   :  { %v3658_v26 = vpop.f32.mrb[41].mxu1  ;;  %v1354_v27 = vsel %vm250_vm2, %v1348_v25, -inf }
 0xc4c   :  { %1355 = vmax.xlane.f32.xlu0 %v1354_v27  ;;  %v1351_v28 = vpop.f32.mrb[42].mxu1  ;;  %v4424_v26 = vld [vmem:[%s4725_s9] ss:$0 sm:$0xff] }
 0xc4d   :  { %v3659_v29 = vpop.f32.mrb[43].mxu1  ;;  %v4429_v28 = vld [vmem:[%s4726_s10] ss:$0 sm:$0xff] }
 0xcd9   :  { %v1356_v30 = vpop.xlane.xlu0 %1355 }
 0xcda   :  { %v1357_v31 = vsub.f32 %v1348_v25, %v1356_v30 }
 0xcdc   :  { %v1358_v32 = vmul.f32 1.442695, %v1357_v31  ;;  %v3887_v31 = vld [vmem:[%s4719_s3] sm:$0xff]  }
 0xcde   :  { %3925 = vpow2.f32 %v1358_v32 }
 0xce8   :  { %v3926_v33 = vpop.eup %3925 }
 0xce9   :  { %v1360_v34 = vsel %vm250_vm2, %v3926_v33, 0.0 }
 0xcea   :  { %1361 = vadd.xlane.f32.xlu1 %v1360_v34 }
 0xd77   :  { %v1362_v46 = vpop.xlane.xlu1 %1361 }
 0xd78   :  { %3927 = vrcp.f32 %v1362_v46 }
 0xd82   :  { %v3928_v47 = vpop.eup %3927 }
 0xd83   :  { %v1364_v48 = vmul.f32 %v3928_v47, %v3926_v33  ;;  %v3889_v33 = vld [vmem:[%s4719_s3 + $0x8] sm:$0xff]  }
 0xd85   :  { %v1365_v49 = vpack.c.bf16 %v1364_v48, %v1364_v48 }
 0xd87   :  { %3663 = vmatmul.mubr.msk.bf16.vlgmr.msra.gmra.mrb[44].mxu0 %vm250_vm2, %v1365_v49 }
 0xd88   :  { %3676 = vmatprep.mubr.msk.bf16.mxu0 %vm3978_vm0, %v3977_v1 }
 0xe5a   :  { %v1407_v50 = vpop.f32.mrb[44].mxu0 }
 0xe5b   :  { %v1413_v51 = vpack.c.bf16 %v1407_v50, %v1407_v50  ;;  %v3664_v52 = vpop.f32.mrb[45].mxu0 }
 0xe5c   :  { %v1410_v53 = vpop.f32.mrb[46].mxu0 }
 0xe5d   :  { %v3665_v54 = vpop.f32.mrb[47].mxu0  ;;  %3669 = vmatmul.mubr.msk.bf16.vlgmr.msra.gmra.mrb[44].mxu1 %vm250_vm2, %v1413_v51 }
 0xe5e   :  { %3684 = vmatprep.mubr.msk.bf16.mxu1 %vm3978_vm0, %v3977_v1  ;;  %3681 = vmatpush3.bf16.msra.mxu1 %v3888_v17 }
 0xe5f   :  { %3682 = vmatprep.subr.bf16.mxu1 %v3977_v1 }
 0xe62   :  { %3683 = vmatpush3.bf16.msra.mxu1 %v3890_v18  ;;  %v3896_v18 = vld [vmem:[%s4717_s1 + $0x18] sm:$0xff]  }
 0xe63   :  { %3696 = vmatprep.subr.bf16.mxu1 %v3977_v1 }
 0xe65   :  { %3685 = vmatmul.mubr.msk.bf16.vlgmr.msra.gmra.mrb[48].mxu1 %vm77_vm1, %v4414_v21 }
 0xe66   :  { %3700 = vmatprep.mubr.msk.bf16.mxu1 %vm3978_vm0, %v3977_v1 }
 0xf30   :  { %v1456_v56 = vpop.f32.mrb[44].mxu1 }
 0xf31   :  { %v1462_v58 = vadd.f32 %v1456_v56, %v4330_v0  ;;  %v3670_v61 = vpop.f32.mrb[45].mxu1  ;;  %v3885_v0 = vld [vmem:[%s4727_s11] sm:$0xff]  }
 0xf32   :  { %v1459_v62 = vpop.f32.mrb[46].mxu1  ;;  %3673 = vmatpush3.bf16.msra.mxu0 %v3885_v0 }
 0xf33   :  { %v1470_v63 = vadd.f32 %v4385_v57, %v1462_v58  ;;  %v3671_v2 = vpop.f32.mrb[47].mxu1  ;;  %3674 = vmatprep.subr.bf16.mxu0 %v3977_v1 }
 0xf35   :  { %v1471_v4 = vadd.f32 %v1470_v63, %v4083_v5  ;;  %v3886_v5 = vld [vmem:[%s4727_s11 + $0x8] sm:$0xff]  }
 0xf36   :  { %3675 = vmatpush3.bf16.msra.mxu0 %v3886_v5 }
 0xf37   :  { %v1474_v9 = vsel %vm77_vm1, %v1471_v4, 0.0  ;;  %3688 = vmatprep.subr.bf16.mxu0 %v3977_v1 }
 0xf38   :  { %1475 = vadd.xlane.f32.xlu0 %v1474_v9  ;;  %v1664_v34 = vpop.f32.mrb[48].mxu1 }
 0xf39   :  { %v3686_v36 = vpop.f32.mrb[49].mxu1  ;;  %v1665_v47 = vadd.f32 %v4109_v8, %v1664_v34  ;;  %v3892_v8 = vld [vmem:[%s4721_s5 + $0x8] sm:$0xff]  }
 0xf3a   :  { %v1667_v6 = vpop.f32.mrb[50].mxu1 }
 0xf3b   :  { %v3687_v37 = vpop.f32.mrb[51].mxu1  ;;  %v1796_v52 = vmul.f32 0.35355338, %v1665_v47 }
 0xf3d   :  { %v1797_v53 = vpack.c.bf16 %v1796_v52, %v1796_v52 }
 0xfc5   :  { %v1476_v13 = vpop.xlane.xlu0 %1475 }
 0xfc6   :  { %v1478_v14 = vmul.f32 0.03125, %v1476_v13 }
 0xfc8   :  { %v1479_v15 = vsub.f32 %v1471_v4, %v1478_v14 }
 0xfca   :  { %v1480_v3 = vmul.f32 %v1479_v15, %v1479_v15 }
 0xfcc   :  { %v1481_v16 = vsel %vm77_vm1, %v1480_v3, 0.0 }
 0xfcd   :  { %1482 = vadd.xlane.f32.xlu1 %v1481_v16 }
0x105a   :  { %v1483_v22 = vpop.xlane.xlu1 %1482 }
0x105b   :  { %v1484_v23 = vmul.f32 0.03125, %v1483_v22 }
0x105d   :  { %v1485_v24 = vadd.f32 1e-05, %v1484_v23 }
0x105f   :  { %3929 = vrsqrt.f32 %v1485_v24 }
0x1069   :  { %v3930_v25 = vpop.eup %3929 }
0x106a   :  { %v1487_v27 = vmul.f32 %v3930_v25, %v1479_v15  ;;  %v3893_v25 = vld [vmem:[%s4719_s3 + $0x10] sm:$0xff]  }
0x106c   :  { %v1494_v29 = vmul.f32 %v4424_v26, %v1487_v27 }
0x106e   :  { %v4433_v30 = vadd.f32 %v4429_v28, %v1494_v29  ;;  %v3895_v29 = vld [vmem:[%s4719_s3 + $0x18] sm:$0xff]  }
0x1070   :  { %v1502_v32 = vpack.c.bf16 %v4433_v30, %v4433_v30 }
0x1072   :  { %3677 = vmatmul.mubr.msk.bf16.vlgmr.msra.gmra.mrb[48].mxu0 %vm77_vm1, %v1502_v32 }
0x1073   :  { %3689 = vmatpush3.bf16.msra.mxu0 %v3887_v31  ;;  %3692 = vmatprep.mubr.msk.bf16.mxu0 %vm3978_vm0, %v3977_v1 }
0x1074   :  { %3690 = vmatprep.subr.bf16.mxu0 %v3977_v1 }
0x1077   :  { %3691 = vmatpush3.bf16.msra.mxu0 %v3889_v33 }
0x1078   :  { %3704 = vmatprep.subr.bf16.mxu0 %v3977_v1 }
0x107a   :  { %3693 = vmatmul.mubr.msk.bf16.vlgmr.msra.gmra.mrb[52].mxu0 %vm77_vm1, %v4414_v21 }
0x107b   :  { %3706 = vmatprep.mubr.msk.bf16.mxu0 %vm3978_vm0, %v3977_v1 }
0x1145   :  { %v4452_v40 = vpop.f32.mrb[48].mxu0 }
0x1146   :  { %v3678_v41 = vpop.f32.mrb[49].mxu0 }
0x1147   :  { %v1566_v42 = vpop.f32.mrb[50].mxu0 }
0x1148   :  { %v3679_v43 = vpop.f32.mrb[51].mxu0 }
0x114d   :  { %v1727_v44 = vpop.f32.mrb[52].mxu0 }
0x114e   :  { %v1728_v45 = vadd.f32 %v4104_v7, %v1727_v44  ;;  %v3694_v46 = vpop.f32.mrb[53].mxu0  ;;  %v3891_v7 = vld [vmem:[%s4721_s5] sm:$0xff]  }
0x114f   :  { %v1730_v48 = vpop.f32.mrb[54].mxu0  ;;  %3697 = vmatpush3.bf16.msra.mxu1 %v3891_v7 }
0x1150   :  { %v1798_v49 = vpack.c.bf16 %v1728_v45, %v1728_v45  ;;  %v3695_v50 = vpop.f32.mrb[55].mxu0  ;;  %3698 = vmatprep.subr.bf16.mxu1 %v3977_v1 }
0x1152   :  { %v1803_v51 = vsel %vm250_vm2, %v1798_v49, 0 }
0x1153   :  { %3705 = vmatpush3.bf16.xpose.msra.mxu0 %v1803_v51  ;;  %3699 = vmatpush3.bf16.msra.mxu1 %v3892_v8 }
0x1154   :  { %3716 = vmatprep.subr.bf16.mxu0 %v3977_v1  ;;  %3710 = vmatprep.subr.bf16.mxu1 %v3977_v1 }
0x1156   :  { %3701 = vmatmul.mubr.msk.bf16.vlgmr.msra.gmra.mrb[52].mxu1 %vm77_vm1, %v4414_v21 }
0x1157   :  { %3712 = vmatprep.mubr.msk.bf16.mxu1 %vm3978_vm0, %v3977_v1 }
0x115a   :  { %3707 = vmatmul.mubr.msk.bf16.vlgmr.msra.gmra.mrb[56].mxu0 %vm250_vm2, %v1797_v53 }
0x115b   :  { %3720 = vmatprep.mubr.msk.bf16.mxu0 %vm3978_vm0, %v3977_v1 }
0x1229   :  { %v1790_v63 = vpop.f32.mrb[52].mxu1 }
0x122a   :  { %v1791_v2 = vadd.f32 %v4135_v38, %v1790_v63  ;;  %v3702_v4 = vpop.f32.mrb[53].mxu1  ;;  %v3894_v38 = vld [vmem:[%s4717_s1 + $0x10] sm:$0xff]  }
0x122b   :  { %v1793_v9 = vpop.f32.mrb[54].mxu1  ;;  %3717 = vmatpush3.bf16.msra.mxu0 %v3894_v38 }
0x122c   :  { %v1857_v13 = vpack.c.bf16 %v1791_v2, %v1791_v2  ;;  %v3703_v14 = vpop.f32.mrb[55].mxu1  ;;  %3718 = vmatprep.subr.bf16.mxu0 %v3977_v1 }
0x122d   :  { %v1839_v54 = vpop.f32.mrb[56].mxu0 }
0x122e   :  { %v3708_v56 = vpop.f32.mrb[57].mxu0  ;;  %v1845_v58 = vsel %vm250_vm2, %v1839_v54, -inf  ;;  %v1862_v15 = vsel %vm313_vm3, %v1857_v13, 0 }
0x122f   :  { %1846 = vmax.xlane.f32.xlu0 %v1845_v58  ;;  %v1842_v61 = vpop.f32.mrb[58].mxu0  ;;  %3711 = vmatpush3.bf16.msra.mxu1 %v1862_v15 }
0x1230   :  { %v3709_v62 = vpop.f32.mrb[59].mxu0  ;;  %3724 = vmatprep.subr.bf16.mxu1 %v3977_v1  ;;  %3719 = vmatpush3.bf16.msra.mxu0 %v3896_v18 }
0x1231   :  { %3732 = vmatprep.subr.bf16.mxu0 %v3977_v1 }
0x1233   :  { %3721 = vmatmul.mubr.msk.bf16.vlgmr.msra.gmra.mrb[60].mxu0 %vm77_vm1, %v4414_v21 }
0x1234   :  { %3736 = vmatprep.mubr.msk.bf16.mxu0 %vm3978_vm0, %v3977_v1 }
0x12bc   :  { %v1847_v3 = vpop.xlane.xlu0 %1846 }
0x12bd   :  { %v1848_v16 = vsub.f32 %v1839_v54, %v1847_v3 }
0x12bf   :  { %v1849_v0 = vmul.f32 1.442695, %v1848_v16  ;;  %v3304_v16 = vld [vmem:[%s4723_s7 + $0x4] sm:$0xf] }
0x12c1   :  { %3931 = vpow2.f32 %v1849_v0  ;;  %v2209_v0 = vsel %vm313_vm3, %v3304_v16, 0 }
0x12cb   :  { %v3932_v5 = vpop.eup %3931 }
0x12cc   :  { %v1851_v17 = vsel %vm250_vm2, %v3932_v5, 0.0 }
0x12cd   :  { %1852 = vadd.xlane.f32.xlu1 %v1851_v17 }
0x1306   :  { %v1963_v31 = vpop.f32.mrb[60].mxu0 }
0x1307   :  { %v3722_v32 = vpop.f32.mrb[61].mxu0  ;;  %v1964_v45 = vadd.f32 %v4177_v60, %v1963_v31  ;;  %v3898_v60 = vld [vmem:[%s4721_s5 + $0x18] sm:$0xff]  }
0x1308   :  { %v1966_v33 = vpop.f32.mrb[62].mxu0 }
0x1309   :  { %v3723_v34 = vpop.f32.mrb[63].mxu0  ;;  %v2095_v50 = vmul.f32 0.35355338, %v1964_v45 }
0x130b   :  { %v2096_v51 = vpack.c.bf16 %v2095_v50, %v2095_v50 }
0x135a   :  { %v1853_v22 = vpop.xlane.xlu1 %1852 }
0x135b   :  { %3933 = vrcp.f32 %v1853_v22 }
0x1365   :  { %v3934_v23 = vpop.eup %3933 }
0x1366   :  { %v1855_v24 = vmul.f32 %v3934_v23, %v3932_v5  ;;  %v3899_v23 = vld [vmem:[%s4719_s3 + $0x20] sm:$0xff]  }
0x1368   :  { %v1856_v27 = vpack.c.bf16 %v1855_v24, %v1855_v24 }
0x136a   :  { %3713 = vmatmul.mubr.msk.bf16.vlgmr.msra.gmra.mrb[56].mxu1 %vm250_vm2, %v1856_v27 }
0x136b   :  { %3725 = vmatpush3.bf16.msra.mxu1 %v3893_v25  ;;  %3728 = vmatprep.mubr.msk.bf16.mxu1 %vm3978_vm0, %v3977_v1  ;;  %v3900_v25 = vld [vmem:[%s4719_s3 + $0x28] sm:$0xff]  }
0x136c   :  { %3726 = vmatprep.subr.bf16.mxu1 %v3977_v1 }
0x136f   :  { %3727 = vmatpush3.bf16.msra.mxu1 %v3895_v29  ;;  %v3901_v29 = vld [vmem:[%s4717_s1 + $0x20] sm:$0xff]  }
0x1370   :  { %3740 = vmatprep.subr.bf16.mxu1 %v3977_v1 }
0x1372   :  { %3729 = vmatmul.mubr.msk.bf16.vlgmr.msra.gmra.mrb[60].mxu1 %vm77_vm1, %v4414_v21 }
0x1373   :  { %3742 = vmatprep.mubr.msk.bf16.mxu1 %vm3978_vm0, %v3977_v1 }
0x143d   :  { %v4505_v36 = vpop.f32.mrb[56].mxu1 }
0x143e   :  { %v3714_v6 = vpop.f32.mrb[57].mxu1  ;;  %v1904_v24 = vpack.c.bf16 %v4505_v36, %v4505_v36  ;;  %v3902_v36 = vld [vmem:[%s4717_s1 + $0x28] sm:$0xff]  }
0x143f   :  { %v1901_v37 = vpop.f32.mrb[58].mxu1 }
0x1440   :  { %v3715_v41 = vpop.f32.mrb[59].mxu1 }
0x1445   :  { %v2026_v42 = vpop.f32.mrb[60].mxu1 }
0x1446   :  { %v2027_v43 = vadd.f32 %v4172_v59, %v2026_v42  ;;  %v3730_v44 = vpop.f32.mrb[61].mxu1  ;;  %v3897_v59 = vld [vmem:[%s4721_s5 + $0x10] sm:$0xff]  }
0x1447   :  { %v2029_v46 = vpop.f32.mrb[62].mxu1  ;;  %3733 = vmatpush3.bf16.msra.mxu0 %v3897_v59 }
0x1448   :  { %v2097_v47 = vpack.c.bf16 %v2027_v43, %v2027_v43  ;;  %v3731_v48 = vpop.f32.mrb[63].mxu1  ;;  %3734 = vmatprep.subr.bf16.mxu0 %v3977_v1 }
0x144a   :  { %v2102_v49 = vsel %vm250_vm2, %v2097_v47, 0 }
0x144b   :  { %3741 = vmatpush3.bf16.xpose.msra.mxu1 %v2102_v49  ;;  %3735 = vmatpush3.bf16.msra.mxu0 %v3898_v60 }
0x144c   :  { %3752 = vmatprep.subr.bf16.mxu1 %v3977_v1  ;;  %3746 = vmatprep.subr.bf16.mxu0 %v3977_v1 }
0x144e   :  { %3737 = vmatmul.mubr.msk.bf16.vlgmr.msra.gmra.mrb[64].mxu0 %vm77_vm1, %v4414_v21 }
0x144f   :  { %3748 = vmatprep.mubr.msk.bf16.mxu0 %vm3978_vm0, %v3977_v1 }
0x1452   :  { %3743 = vmatmul.mubr.msk.bf16.vlgmr.msra.gmra.mrb[64].mxu1 %vm250_vm2, %v2096_v51 }
0x1453   :  { %3754 = vmatprep.mubr.msk.bf16.mxu1 %vm3978_vm0, %v3977_v1  ;;  %3753 = vmatpush3.bf16.msra.mxu1 %v2209_v0 }
0x1454   :  { %3764 = vmatprep.subr.bf16.mxu1 %v3977_v1 }
0x1521   :  { %v2089_v2 = vpop.f32.mrb[64].mxu0 }
0x1522   :  { %v3738_v4 = vpop.f32.mrb[65].mxu0  ;;  %v2090_v14 = vadd.f32 %v4202_v19, %v2089_v2  ;;  %v1905_v19 = vld [vmem:[%s4723_s7] sm:$0xf] }
0x1523   :  { %v2092_v9 = vpop.f32.mrb[66].mxu0  ;;  %v2255_v22 = vsel %vm313_vm3, %v1905_v19, 0 }
0x1524   :  { %v3739_v13 = vpop.f32.mrb[67].mxu0  ;;  %v2156_v15 = vpack.c.bf16 %v2090_v14, %v2090_v14 }
0x1525   :  { %v2138_v52 = vpop.f32.mrb[64].mxu1 }
0x1526   :  { %v3744_v53 = vpop.f32.mrb[65].mxu1  ;;  %v2144_v7 = vsel %vm250_vm2, %v2138_v52, -inf  ;;  %v2161_v3 = vsel %vm313_vm3, %v2156_v15, 0 }
0x1527   :  { %2145 = vmax.xlane.f32.xlu0 %v2144_v7  ;;  %v2141_v8 = vpop.f32.mrb[66].mxu1  ;;  %3747 = vmatpush3.bf16.msra.mxu0 %v2161_v3 }
0x1528   :  { %v3745_v54 = vpop.f32.mrb[67].mxu1  ;;  %3758 = vmatprep.subr.bf16.mxu0 %v3977_v1 }
0x15b4   :  { %v2146_v56 = vpop.xlane.xlu0 %2145 }
0x15b5   :  { %v2147_v58 = vsub.f32 %v2138_v52, %v2146_v56 }
0x15b7   :  { %v2148_v61 = vmul.f32 1.442695, %v2147_v58 }
0x15b9   :  { %3935 = vpow2.f32 %v2148_v61  ;;  %v3903_v61 = vld [vmem:[%s4721_s5 + $0x20] sm:$0xff]  }
0x15c3   :  { %v3936_v62 = vpop.eup %3935 }
0x15c4   :  { %v2150_v63 = vsel %vm250_vm2, %v3936_v62, 0.0 }
0x15c5   :  { %2151 = vadd.xlane.f32.xlu1 %v2150_v63 }
0x1652   :  { %v2152_v5 = vpop.xlane.xlu1 %2151 }
0x1653   :  { %3937 = vrcp.f32 %v2152_v5 }
0x165d   :  { %v3938_v17 = vpop.eup %3937 }
0x165e   :  { %v2154_v38 = vmul.f32 %v3938_v17, %v3936_v62  ;;  %v3904_v62 = vld [vmem:[%s4721_s5 + $0x28] sm:$0xff]  }
0x1660   :  { %v2155_v18 = vpack.c.bf16 %v2154_v38, %v2154_v38 }
0x1662   :  { %3749 = vmatmul.mubr.msk.bf16.vlgmr.msra.gmra.mrb[68].mxu0 %vm250_vm2, %v2155_v18 }
0x1663   :  { %3759 = vmatpush3.bf16.msra.mxu0 %v2255_v22  ;;  %3760 = vmatprep.mubr.msk.bf16.mxu0 %vm3978_vm0, %v3977_v1 }
0x1664   :  { %3772 = vmatprep.subr.bf16.mxu0 %v3977_v1 }
0x166a   :  { %3761 = vmatmul.mubr.msk.bf16.vlgmr.msra.gmra.mrb[72].mxu0 %vm250_vm2, %v1904_v24 }
0x166b   :  { %3773 = vmatpush3.bf16.msra.mxu0 %v3899_v23  ;;  %3776 = vmatprep.mubr.msk.bf16.mxu0 %vm3978_vm0, %v3977_v1 }
0x166c   :  { %3774 = vmatprep.subr.bf16.mxu0 %v3977_v1 }
0x166f   :  { %3775 = vmatpush3.bf16.msra.mxu0 %v3900_v25 }
0x1670   :  { %3788 = vmatprep.subr.bf16.mxu0 %v3977_v1 }
0x1672   :  { %3777 = vmatmul.mubr.msk.bf16.vlgmr.msra.gmra.mrb[76].mxu0 %vm77_vm1, %v4414_v21 }
0x1673   :  { %3790 = vmatprep.mubr.msk.bf16.mxu0 %vm3978_vm0, %v3977_v1 }
0x1735   :  { %v2197_v27 = vpop.f32.mrb[68].mxu0 }
0x1736   :  { %v2203_v31 = vpack.c.bf16 %v2197_v27, %v2197_v27  ;;  %v3750_v32 = vpop.f32.mrb[69].mxu0 }
0x1737   :  { %v2200_v33 = vpop.f32.mrb[70].mxu0  ;;  %v3908_v32 = vld [vmem:[%s4717_s1 + $0x38] sm:$0xff]  }
0x1738   :  { %v3751_v34 = vpop.f32.mrb[71].mxu0  ;;  %3755 = vmatmul.mubr.msk.bf16.vlgmr.msra.gmra.mrb[68].mxu1 %vm250_vm2, %v2203_v31  ;;  %v3906_v31 = vld [vmem:[%s4717_s1 + $0x30] sm:$0xff]  }
0x1739   :  { %3765 = vmatpush3.bf16.msra.mxu1 %v3901_v29  ;;  %3768 = vmatprep.mubr.msk.bf16.mxu1 %vm3978_vm0, %v3977_v1  ;;  %v3905_v34 = vld [vmem:[%s4719_s3 + $0x30] sm:$0xff]  }
0x173a   :  { %3766 = vmatprep.subr.bf16.mxu1 %v3977_v1 }
0x173d   :  { %v2291_v6 = vpop.f32.mrb[72].mxu0  ;;  %3767 = vmatpush3.bf16.msra.mxu1 %v3902_v36 }
0x173e   :  { %v3762_v37 = vpop.f32.mrb[73].mxu0  ;;  %3780 = vmatprep.subr.bf16.mxu1 %v3977_v1 }
0x173f   :  { %v2294_v41 = vpop.f32.mrb[74].mxu0 }
0x1740   :  { %v3763_v42 = vpop.f32.mrb[75].mxu0  ;;  %3769 = vmatmul.mubr.msk.bf16.vlgmr.msra.gmra.mrb[72].mxu1 %vm77_vm1, %v4414_v21 }
0x1741   :  { %3784 = vmatprep.mubr.msk.bf16.mxu1 %vm3978_vm0, %v3977_v1  ;;  %3781 = vmatpush3.bf16.msra.mxu1 %v3903_v61  ;;  %v3907_v42 = vld [vmem:[%s4719_s3 + $0x38] sm:$0xff]  }
0x1742   :  { %3782 = vmatprep.subr.bf16.mxu1 %v3977_v1 }
0x1745   :  { %v2417_v43 = vpop.f32.mrb[76].mxu0  ;;  %3783 = vmatpush3.bf16.msra.mxu1 %v3904_v62 }
0x1746   :  { %v2418_v44 = vadd.f32 %v4256_v55, %v2417_v43  ;;  %v3778_v45 = vpop.f32.mrb[77].mxu0  ;;  %3794 = vmatprep.subr.bf16.mxu1 %v3977_v1 }
0x1747   :  { %v2420_v46 = vpop.f32.mrb[78].mxu0 }
0x1748   :  { %v2488_v47 = vpack.c.bf16 %v2418_v44, %v2418_v44  ;;  %v3779_v48 = vpop.f32.mrb[79].mxu0  ;;  %3785 = vmatmul.mubr.msk.bf16.vlgmr.msra.gmra.mrb[76].mxu1 %vm77_vm1, %v4414_v21 }
0x1749   :  { %3796 = vmatprep.mubr.msk.bf16.mxu1 %vm3978_vm0, %v3977_v1 }
0x174a   :  { %v2493_v49 = vsel %vm250_vm2, %v2488_v47, 0 }
0x174b   :  { %3789 = vmatpush3.bf16.xpose.msra.mxu0 %v2493_v49 }
0x174c   :  { %3800 = vmatprep.subr.bf16.mxu0 %v3977_v1 }
0x180b   :  { %v2245_v50 = vpop.f32.mrb[68].mxu1 }
0x180c   :  { %v4579_v51 = vadd.f32 %v2291_v6, %v2245_v50  ;;  %v3756_v59 = vpop.f32.mrb[69].mxu1 }
0x180d   :  { %v2248_v60 = vpop.f32.mrb[70].mxu1 }
0x180e   :  { %v3757_v52 = vpop.f32.mrb[71].mxu1 }
0x1813   :  { %v2354_v53 = vpop.f32.mrb[72].mxu1 }
0x1814   :  { %v2355_v7 = vadd.f32 %v4266_v11, %v2354_v53  ;;  %v3770_v8 = vpop.f32.mrb[73].mxu1 }
0x1815   :  { %v2357_v55 = vpop.f32.mrb[74].mxu1 }
0x1816   :  { %v2486_v54 = vmul.f32 0.35355338, %v2355_v7  ;;  %v3771_v56 = vpop.f32.mrb[75].mxu1 }
0x1818   :  { %v2487_v58 = vpack.c.bf16 %v2486_v54, %v2486_v54 }
0x181a   :  { %3791 = vmatmul.mubr.msk.bf16.vlgmr.msra.gmra.mrb[80].mxu0 %vm250_vm2, %v2487_v58 }
0x181b   :  { %3802 = vmatprep.mubr.msk.bf16.mxu0 %vm3978_vm0, %v3977_v1  ;;  %v2480_v13 = vpop.f32.mrb[76].mxu1 }
0x181c   :  { %v2481_v14 = vadd.f32 %v4289_v35, %v2480_v13  ;;  %v3786_v15 = vpop.f32.mrb[77].mxu1  ;;  %v3336_v35 = vld [vmem:[%s4723_s7 + $0x8] sm:$0xf] }
0x181d   :  { %v2483_v3 = vpop.f32.mrb[78].mxu1  ;;  %v2600_v23 = vsel %vm313_vm3, %v3336_v35, 0 }
0x181e   :  { %v2547_v16 = vpack.c.bf16 %v2481_v14, %v2481_v14  ;;  %v3787_v0 = vpop.f32.mrb[79].mxu1  ;;  %3801 = vmatpush3.bf16.msra.mxu0 %v2600_v23 }
0x181f   :  { %3814 = vmatprep.subr.bf16.mxu0 %v3977_v1 }
0x1820   :  { %v2552_v5 = vsel %vm313_vm3, %v2547_v16, 0 }
0x1821   :  { %3795 = vmatpush3.bf16.msra.mxu1 %v2552_v5 }
0x1822   :  { %3806 = vmatprep.subr.bf16.mxu1 %v3977_v1 }
0x18ed   :  { %v2529_v11 = vpop.f32.mrb[80].mxu0 }
0x18ee   :  { %v3792_v63 = vpop.f32.mrb[81].mxu0  ;;  %v2535_v2 = vsel %vm250_vm2, %v2529_v11, -inf }
0x18ef   :  { %2536 = vmax.xlane.f32.xlu0 %v2535_v2  ;;  %v2532_v4 = vpop.f32.mrb[82].mxu0 }
0x18f0   :  { %v3793_v9 = vpop.f32.mrb[83].mxu0 }
0x197c   :  { %v2537_v17 = vpop.xlane.xlu0 %2536 }
0x197d   :  { %v2538_v19 = vsub.f32 %v2529_v11, %v2537_v17 }
0x197f   :  { %v2539_v38 = vmul.f32 1.442695, %v2538_v19 }
0x1981   :  { %3939 = vpow2.f32 %v2539_v38 }
0x198b   :  { %v3940_v18 = vpop.eup %3939 }
0x198c   :  { %v2541_v22 = vsel %vm250_vm2, %v3940_v18, 0.0 }
0x198d   :  { %2542 = vadd.xlane.f32.xlu1 %v2541_v22 }
0x1a1a   :  { %v2543_v24 = vpop.xlane.xlu1 %2542 }
0x1a1b   :  { %3941 = vrcp.f32 %v2543_v24 }
0x1a25   :  { %v3942_v25 = vpop.eup %3941 }
0x1a26   :  { %v2545_v27 = vmul.f32 %v3942_v25, %v3940_v18 }
0x1a28   :  { %v2546_v29 = vpack.c.bf16 %v2545_v27, %v2545_v27 }
0x1a2a   :  { %3797 = vmatmul.mubr.msk.bf16.vlgmr.msra.gmra.mrb[80].mxu1 %vm250_vm2, %v2546_v29 }
0x1a2b   :  { %3810 = vmatprep.mubr.msk.bf16.mxu1 %vm3978_vm0, %v3977_v1  ;;  %3807 = vmatpush3.bf16.msra.mxu1 %v3906_v31 }
0x1a2c   :  { %3808 = vmatprep.subr.bf16.mxu1 %v3977_v1 }
0x1a2f   :  { %3809 = vmatpush3.bf16.msra.mxu1 %v3908_v32  ;;  %v3254_v32 = vld [vmem:[%s4728_s12] ss:$0 sm:$0xff] }
0x1a30   :  { %3822 = vmatprep.subr.bf16.mxu1 %v3977_v1 }
0x1a32   :  { %3811 = vmatmul.mubr.msk.bf16.vlgmr.msra.gmra.mrb[84].mxu1 %vm77_vm1, %v4414_v21 }
0x1a33   :  { %3826 = vmatprep.mubr.msk.bf16.mxu1 %vm3978_vm0, %v3977_v1 }
0x1afd   :  { %v2588_v33 = vpop.f32.mrb[80].mxu1 }
0x1afe   :  { %v2594_v36 = vpack.c.bf16 %v2588_v33, %v2588_v33  ;;  %v3798_v6 = vpop.f32.mrb[81].mxu1  ;;  %v1564_v33 = vadd.f32 %v3254_v32, %v4452_v40 }
0x1aff   :  { %v2591_v37 = vpop.f32.mrb[82].mxu1 }
0x1b00   :  { %v3799_v41 = vpop.f32.mrb[83].mxu1  ;;  %3803 = vmatmul.mubr.msk.bf16.vlgmr.msra.gmra.mrb[84].mxu0 %vm250_vm2, %v2594_v36 }
0x1b01   :  { %3815 = vmatpush3.bf16.msra.mxu0 %v3905_v34  ;;  %3818 = vmatprep.mubr.msk.bf16.mxu0 %vm3978_vm0, %v3977_v1  ;;  %v1569_v41 = vmax.f32 %v1564_v33, 0.0 }
0x1b02   :  { %3816 = vmatprep.subr.bf16.mxu0 %v3977_v1 }
0x1b05   :  { %3817 = vmatpush3.bf16.msra.mxu0 %v3907_v42  ;;  %v2700_v43 = vpop.f32.mrb[84].mxu1 }
0x1b06   :  { %3830 = vmatprep.subr.bf16.mxu0 %v3977_v1  ;;  %v3812_v44 = vpop.f32.mrb[85].mxu1  ;;  %v2701_v7 = vadd.f32 %v4340_v12, %v2700_v43  ;;  %v3910_v12 = vld [vmem:[%s4721_s5 + $0x38] sm:$0xff]  }
0x1b07   :  { %v2703_v45 = vpop.f32.mrb[86].mxu1 }
0x1b08   :  { %3819 = vmatmul.mubr.msk.bf16.vlgmr.msra.gmra.mrb[88].mxu0 %vm77_vm1, %v4414_v21  ;;  %v3813_v46 = vpop.f32.mrb[87].mxu1  ;;  %v2832_v58 = vmul.f32 0.35355338, %v2701_v7  ;;  %v3912_v7 = vld [vmem:[%s4727_s11 + $0x8] sm:$0xff]  }
0x1b09   :  { %3832 = vmatprep.mubr.msk.bf16.mxu0 %vm3978_vm0, %v3977_v1  ;;  %v1570_v46 = vadd.f32 %v1569_v41, %v4433_v30  ;;  %v3911_v30 = vld [vmem:[%s4727_s11] sm:$0xff]  }
0x1bd3   :  { %v2636_v47 = vpop.f32.mrb[84].mxu0 }
0x1bd4   :  { %v4638_v48 = vadd.f32 %v2636_v47, %v4579_v51  ;;  %v3804_v49 = vpop.f32.mrb[85].mxu0  ;;  %v2833_v51 = vpack.c.bf16 %v2832_v58, %v2832_v58  ;;  %v1573_v47 = vsel %vm77_vm1, %v1570_v46, 0.0 }
0x1bd5   :  { %v2639_v50 = vpop.f32.mrb[86].mxu0 }
0x1bd6   :  { %v3805_v59 = vpop.f32.mrb[87].mxu0 }
0x1bdb   :  { %v2763_v60 = vpop.f32.mrb[88].mxu0 }
0x1bdc   :  { %v2764_v52 = vadd.f32 %v4335_v10, %v2763_v60  ;;  %v3820_v53 = vpop.f32.mrb[89].mxu0  ;;  %v3909_v10 = vld [vmem:[%s4721_s5 + $0x30] sm:$0xff]  }
0x1bdd   :  { %v2766_v8 = vpop.f32.mrb[90].mxu0  ;;  %3823 = vmatpush3.bf16.msra.mxu1 %v3909_v10 }
0x1bde   :  { %v2834_v55 = vpack.c.bf16 %v2764_v52, %v2764_v52  ;;  %v3821_v54 = vpop.f32.mrb[91].mxu0  ;;  %3824 = vmatprep.subr.bf16.mxu1 %v3977_v1 }
0x1be0   :  { %v2839_v56 = vsel %vm250_vm2, %v2834_v55, 0 }
0x1be1   :  { %3831 = vmatpush3.bf16.xpose.msra.mxu0 %v2839_v56  ;;  %3825 = vmatpush3.bf16.msra.mxu1 %v3910_v12 }
0x1be2   :  { %3842 = vmatprep.subr.bf16.mxu0 %v3977_v1  ;;  %3836 = vmatprep.subr.bf16.mxu1 %v3977_v1 }
0x1be4   :  { %3827 = vmatmul.mubr.msk.bf16.vlgmr.msra.gmra.mrb[88].mxu1 %vm77_vm1, %v4414_v21 }
0x1be5   :  { %3838 = vmatprep.mubr.msk.bf16.mxu1 %vm3978_vm0, %v3977_v1 }
0x1be8   :  { %3833 = vmatmul.mubr.msk.bf16.vlgmr.msra.gmra.mrb[92].mxu0 %vm250_vm2, %v2833_v51 }
0x1be9   :  { %3844 = vmatprep.mubr.msk.bf16.mxu0 %vm3978_vm0, %v3977_v1 }
0x1cb7   :  { %v2826_v4 = vpop.f32.mrb[88].mxu1 }
0x1cb8   :  { %v2827_v9 = vadd.f32 %v4366_v39, %v2826_v4  ;;  %v3828_v13 = vpop.f32.mrb[89].mxu1  ;;  %v3367_v39 = vld [vmem:[%s4723_s7 + $0xc] sm:$0xf] }
0x1cb9   :  { %v2829_v14 = vpop.f32.mrb[90].mxu1  ;;  %v2946_v38 = vsel %vm313_vm3, %v3367_v39, 0 }
0x1cba   :  { %v2893_v15 = vpack.c.bf16 %v2827_v9, %v2827_v9  ;;  %v3829_v3 = vpop.f32.mrb[91].mxu1  ;;  %3843 = vmatpush3.bf16.msra.mxu0 %v2946_v38 }
0x1cbb   :  { %v2875_v61 = vpop.f32.mrb[92].mxu0 }
0x1cbc   :  { %v3834_v62 = vpop.f32.mrb[93].mxu0  ;;  %v2881_v11 = vsel %vm250_vm2, %v2875_v61, -inf  ;;  %v2898_v16 = vsel %vm313_vm3, %v2893_v15, 0 }
0x1cbd   :  { %2882 = vmax.xlane.f32.xlu0 %v2881_v11  ;;  %v2878_v63 = vpop.f32.mrb[94].mxu0  ;;  %3837 = vmatpush3.bf16.msra.mxu1 %v2898_v16 }
0x1cbe   :  { %v3835_v2 = vpop.f32.mrb[95].mxu0  ;;  %3848 = vmatprep.subr.bf16.mxu1 %v3977_v1 }
0x1cbf   :  { %v3259_v2 = vld [vmem:[%s4730_s14] ss:$0 sm:$0xff] }
0x1d4a   :  { %v2883_v21 = vpop.xlane.xlu0 %2882 }
0x1d4b   :  { %v2884_v0 = vsub.f32 %v2875_v61, %v2883_v21 }
0x1d4d   :  { %v2885_v5 = vmul.f32 1.442695, %v2884_v0 }
0x1d4f   :  { %3943 = vpow2.f32 %v2885_v5 }
0x1d59   :  { %v3944_v17 = vpop.eup %3943 }
0x1d5a   :  { %v2887_v19 = vsel %vm250_vm2, %v3944_v17, 0.0 }
0x1d5b   :  { %2888 = vadd.xlane.f32.xlu1 %v2887_v19 }
0x1de8   :  { %v2889_v18 = vpop.xlane.xlu1 %2888 }
0x1de9   :  { %3945 = vrcp.f32 %v2889_v18 }
0x1df3   :  { %v3946_v22 = vpop.eup %3945 }
0x1df4   :  { %v2891_v35 = vmul.f32 %v3946_v22, %v3944_v17 }
0x1df6   :  { %v2892_v23 = vpack.c.bf16 %v2891_v35, %v2891_v35 }
0x1df8   :  { %3839 = vmatmul.mubr.msk.bf16.vlgmr.msra.gmra.mrb[92].mxu1 %vm250_vm2, %v2892_v23 }
0x1df9   :  { %3852 = vmatprep.mubr.msk.bf16.mxu1 %vm3978_vm0, %v3977_v1  ;;  %3849 = vmatpush3.bf16.msra.mxu1 %v3911_v30 }
0x1dfa   :  { %3850 = vmatprep.subr.bf16.mxu1 %v3977_v1  ;;  %v3258_v1 = vld [vmem:[%s4729_s13] ss:$0 sm:$0xff]  ;;  %s3979_s13 = smov [#allocation2]  }
0x1dfb   :  { %s3132_s14 = sshll.u32 %s3979_s13, 4  ;;  %s3133_s14 = int_to_ptr.vmem [resolvable:$true] %s3132_s14 }
0x1dfc   :  { %s3953_s27 = scalar_lea.vmem %s3133_s14, 256  ;;  %p3958_p1 = scmp.lt.s32.totalorder %s3133_s14, %s3133_s14 }
0x1dfd   :  { %3851 = vmatpush3.bf16.msra.mxu1 %v3912_v7  ;;  %p3954_p0 = scmp.ne.s32.totalorder %s3133_s14, %s3953_s27  ;;  %p3959_p2 = scmp.lt.s32.totalorder %s3953_s27, %s3953_s27 }
0x1dff   :  { %p3960_p3 = por %p3959_p2, %p3958_p1 }
0x1e01   :  { %p3961_p4 = pnand %p3960_p3, %p3954_p0 }
0x1ecb   :  { %v2934_v24 = vpop.f32.mrb[92].mxu1 }
0x1ecc   :  { %v2940_v25 = vpack.c.bf16 %v2934_v24, %v2934_v24  ;;  %v3840_v27 = vpop.f32.mrb[93].mxu1 }
0x1ecd   :  { %v2937_v29 = vpop.f32.mrb[94].mxu1 }
0x1ece   :  { %v3841_v31 = vpop.f32.mrb[95].mxu1  ;;  %3845 = vmatmul.mubr.msk.bf16.vlgmr.msra.gmra.mrb[96].mxu0 %vm250_vm2, %v2940_v25 }
0x1fa1   :  { %v2982_v34 = vpop.f32.mrb[96].mxu0 }
0x1fa2   :  { %v2988_v36 = vadd.f32 %v2982_v34, %v4638_v48  ;;  %v3846_v6 = vpop.f32.mrb[97].mxu0 }
0x1fa3   :  { %v2985_v37 = vpop.f32.mrb[98].mxu0 }
0x1fa4   :  { %v2996_v42 = vadd.f32 %v4385_v57, %v2988_v36  ;;  %v3847_v43 = vpop.f32.mrb[99].mxu0 }
0x1fa6   :  { %v2997_v44 = vadd.f32 %v4410_v20, %v2996_v42 }
0x1fa8   :  { %v3000_v45 = vsel %vm77_vm1, %v2997_v44, 0.0 }
0x1fa9   :  { %3001 = vadd.xlane.f32.xlu0 %v3000_v45 }
0x1fad   :  { %1574 = vadd.xlane.f32.xlu0 %v1573_v47 }
0x2036   :  { %v3002_v40 = vpop.xlane.xlu0 %3001 }
0x2037   :  { %v3003_v49 = vmul.f32 0.03125, %v3002_v40 }
0x2039   :  { %v3004_v50 = vsub.f32 %v2997_v44, %v3003_v49 }
0x203a   :  { %v1575_v48 = vpop.xlane.xlu0 %1574 }
0x203b   :  { %v1576_v59 = vmul.f32 0.03125, %v1575_v48  ;;  %v3005_v60 = vmul.f32 %v3004_v50, %v3004_v50 }
0x203d   :  { %v1577_v52 = vsub.f32 %v1570_v46, %v1576_v59  ;;  %v3006_v57 = vsel %vm77_vm1, %v3005_v60, 0.0 }
0x203e   :  { %3007 = vadd.xlane.f32.xlu1 %v3006_v57 }
0x203f   :  { %v1578_v53 = vmul.f32 %v1577_v52, %v1577_v52 }
0x2041   :  { %v1579_v20 = vsel %vm77_vm1, %v1578_v53, 0.0 }
0x2042   :  { %1580 = vadd.xlane.f32.xlu0 %v1579_v20 }
0x20cb   :  { %v3008_v8 = vpop.xlane.xlu1 %3007 }
0x20cc   :  { %v3009_v55 = vmul.f32 0.03125, %v3008_v8 }
0x20ce   :  { %v3010_v54 = vadd.f32 1e-05, %v3009_v55 }
0x20cf   :  { %v1581_v56 = vpop.xlane.xlu0 %1580 }
0x20d0   :  { %3947 = vrsqrt.f32 %v3010_v54  ;;  %v1582_v58 = vmul.f32 0.03125, %v1581_v56 }
0x20d2   :  { %v1583_v51 = vadd.f32 1e-05, %v1582_v58 }
0x20d4   :  { %3949 = vrsqrt.f32 %v1583_v51 }
0x20da   :  { %v3948_v10 = vpop.eup %3947 }
0x20db   :  { %v3012_v12 = vmul.f32 %v3948_v10, %v3004_v50 }
0x20dd   :  { %v3019_v61 = vmul.f32 %v4424_v26, %v3012_v12 }
0x20de   :  { %v3950_v62 = vpop.eup %3949 }
0x20df   :  { %v1585_v11 = vmul.f32 %v3950_v62, %v1577_v52  ;;  %v3026_v63 = vadd.f32 %v4429_v28, %v3019_v61 }
0x20e1   :  { %v3027_v4 = vpack.c.bf16 %v3026_v63, %v3026_v63  ;;  %v1592_v9 = vmul.f32 %v3258_v1, %v1585_v11 }
0x20e3   :  { %3853 = vmatmul.mubr.msk.bf16.vlgmr.msra.gmra.mrb[96].mxu1 %vm77_vm1, %v3027_v4  ;;  %v1599_v13 = vadd.f32 %v3259_v2, %v1592_v9 }
0x20e5   :  { %1600 = vst.msk [vmem:[#allocation2] sm:$0xff] %vm77_vm1, %v1599_v13 }
0x21b6   :  { %v3088_v26 = vpop.f32.mrb[96].mxu1 }
0x21b7   :  { %v3089_v14 = vadd.f32 %v3254_v32, %v3088_v26  ;;  %v3854_v15 = vpop.f32.mrb[97].mxu1 }
0x21b8   :  { %v3091_v3 = vpop.f32.mrb[98].mxu1 }
0x21b9   :  { %v3094_v16 = vmax.f32 %v3089_v14, 0.0  ;;  %v3855_v21 = vpop.f32.mrb[99].mxu1 }
0x21bb   :  { %v3095_v0 = vadd.f32 %v3094_v16, %v3026_v63 }
0x21bd   :  { %v3098_v28 = vsel %vm77_vm1, %v3095_v0, 0.0 }
0x21be   :  { %3099 = vadd.xlane.f32.xlu1 %v3098_v28 }
0x224b   :  { %v3100_v5 = vpop.xlane.xlu1 %3099 }
0x224c   :  { %v3101_v17 = vmul.f32 0.03125, %v3100_v5 }
0x224e   :  { %v3102_v19 = vsub.f32 %v3095_v0, %v3101_v17 }
0x2250   :  { %v3103_v39 = vmul.f32 %v3102_v19, %v3102_v19 }
0x2252   :  { %v3104_v38 = vsel %vm77_vm1, %v3103_v39, 0.0 }
0x2253   :  { %3105 = vadd.xlane.f32.xlu1 %v3104_v38 }
0x22e0   :  { %v3106_v18 = vpop.xlane.xlu1 %3105 }
0x22e1   :  { %v3107_v22 = vmul.f32 0.03125, %v3106_v18 }
0x22e3   :  { %v3108_v35 = vadd.f32 1e-05, %v3107_v22 }
0x22e5   :  { %3951 = vrsqrt.f32 %v3108_v35 }
0x22ef   :  { %v3952_v23 = vpop.eup %3951 }
0x22f0   :  { %v3110_v24 = vmul.f32 %v3952_v23, %v3102_v19 }
0x22f2   :  { %v3117_v25 = vmul.f32 %v3258_v1, %v3110_v24 }
0x22f4   :  { %v3124_v27 = vadd.f32 %v3259_v2, %v3117_v25 }
0x22f6   :  { %3126 = vst.msk [vmem:[#allocation2 + $0x8] sm:$0xff] %vm77_vm1, %v3124_v27 }
0x22f7   :  { %3964 = shalt.err (!%p3961_p4)
}
0x22f8   :  { %s3965_s30 = scalar_lea.hbm %s4731_s15, 256 }
0x22f9   :  { %p3966_p5 = scmp.ne.s32.totalorder %s4731_s15, %s3965_s30  ;;  %p3969_p6 = scmp.lt.u32.totalorder %s3965_s30, %s4731_s15 }
0x22fb   :  { %p3971_p7 = pnand %p3969_p6, %p3966_p5 }
0x22fd   :  { %3974 = shalt.err (!%p3971_p7)
}
0x22fe   :  { %s3980_s17 = smov 128   ;;  %s3981_s18 = smov 8  }
0x22ff   :  { %3138 = dma.vmem_to_hbm [thread:$0]  %s3133_s14, 256, %s4731_s15, [#allocation3], %s3980_s17, %s3980_s17, %s3981_s18  }
0x2300   :  { %3975 = dma.done.wait [#allocation3], 256  }
0x2301   :  { %3976 = vsyncadd [#allocation3], 4294967040 }
0x2302   :  { %3142 = vsyncpa [#allocation3], 1 }

</bundles_post_ra>
